<compile_context>
chip_gen: v7x
topology: tpu7x:2x2x1
jax: 0.10.0
libtpu: 0.0.40
codegen_flags: <defaults>
</compile_context>

<pallas_src>
import functools
import math

import jax
import jax.numpy as jnp
from jax import lax
from jax.experimental import pallas as pl
from jax.experimental.pallas import tpu as pltpu

# ---------------------------------------------------------------------------
# Hetero-graph metadata & model hyper-parameters (small shapes).
# ---------------------------------------------------------------------------
NODE_TYPES = ("question", "answer")
EDGE_TYPES = (
    ("question", "question_correct_answer", "answer"),
    ("question", "question_wrong_answer", "answer"),
    ("answer", "rev_question_correct_answer", "question"),
    ("answer", "rev_question_wrong_answer", "question"),
)

CHANNELS = 32
NUM_HEADS = 2
NUM_LAYERS = 1
BATCH_SIZE = 8          # == #question nodes -> BatchNorm branch is exercised
HEAD_DIM = CHANNELS // NUM_HEADS
BN_EPS = 1e-5


# ---------------------------------------------------------------------------
# The single fused kernel.
# ---------------------------------------------------------------------------
def _fused_hgt_kernel(cfg,
                      # SMEM
                      alpha_ref,
                      # VMEM inputs
                      xq_ref, xa_ref,
                      w_in_q_ref, b_in_q_ref, w_in_a_ref, b_in_a_ref,
                      g_q_ref, be_q_ref, g_a_ref, be_a_ref,
                      w_kqv_q_ref, b_kqv_q_ref, w_kqv_a_ref, b_kqv_a_ref,
                      w_out_q_ref, b_out_q_ref, w_out_a_ref, b_out_a_ref,
                      a_bd_ref, m_bd_ref,
                      esrc_ref, edst_ref, dec_q_ref, dec_a_ref,
                      # outputs
                      hq_out_ref, ha_out_ref, pred_out_ref):
    f32 = jnp.float32
    C, H = cfg["channels"], cfg["heads"]
    D = C // H
    n_et = len(cfg["edge_types"])
    n_nodes = {"question": cfg["num_question"], "answer": cfg["num_answer"]}

    # ---- type-wise input Linear + ReLU (+ BatchNorm with batch statistics) ----
    def in_proj(x, w, b, gamma, beta):
        y = jnp.maximum(jnp.dot(x, w, preferred_element_type=f32) + b, 0.0)
        if cfg["apply_bn"]:
            mu = jnp.mean(y, axis=0, keepdims=True)
            var = jnp.mean((y - mu) ** 2, axis=0, keepdims=True)
            y = (y - mu) * lax.rsqrt(var + BN_EPS) * gamma + beta
        return y

    h = {
        "question": in_proj(xq_ref[...], w_in_q_ref[...], b_in_q_ref[...],
                            g_q_ref[...], be_q_ref[...]),
        "answer": in_proj(xa_ref[...], w_in_a_ref[...], b_in_a_ref[...],
                          g_a_ref[...], be_a_ref[...]),
    }

    # Head-lane selection masks, hoisted once (JAX does not CSE broadcasts).
    lane = lax.broadcasted_iota(jnp.int32, (1, C), 1)
    head_mask = [((lane >= hh * D) & (lane < (hh + 1) * D)).astype(f32)
                 for hh in range(H)]

    kqv_refs = {"question": (w_kqv_q_ref, b_kqv_q_ref),
                "answer": (w_kqv_a_ref, b_kqv_a_ref)}
    out_refs = {"question": (w_out_q_ref, b_out_q_ref, 0),
                "answer": (w_out_a_ref, b_out_a_ref, 1)}
    inv_sqrt2 = 1.0 / math.sqrt(2.0)

    for layer in range(cfg["num_layers"]):
        # Fused K|Q|V projection: one [N, C] x [C, 3C] MXU pass per node type.
        kqv = {}
        for nt in NODE_TYPES:
            w_ref, b_ref = kqv_refs[nt]
            z = jnp.dot(h[nt], w_ref[layer], preferred_element_type=f32) + b_ref[layer]
            kqv[nt] = (z[:, 0:C], z[:, C:2 * C], z[:, 2 * C:3 * C])  # k, q, v

        agg = {nt: jnp.zeros((n_nodes[nt], C), f32) for nt in NODE_TYPES}

        for e_idx, (src, dst, n_e, off) in enumerate(cfg["edge_types"]):
            k_src, _, v_src = kqv[src]
            _, q_dst, _ = kqv[dst]
            n_src, n_dst = n_nodes[src], n_nodes[dst]

            # Block-diagonal per-relation transforms; the attention scale
            # p_rel / sqrt(D) is pre-folded into a_bd.
            rel = layer * n_et + e_idx
            kp = jnp.dot(k_src, a_bd_ref[rel], preferred_element_type=f32)
            vp = jnp.dot(v_src, m_bd_ref[rel], preferred_element_type=f32)

            # Adjacency mask built in-kernel from int32 edge indices.
            src_oh = (esrc_ref[off:off + n_e, :] ==
                      lax.broadcasted_iota(jnp.int32, (n_e, n_src), 1)).astype(f32)
            dst_ohT = (edst_ref[:, off:off + n_e] ==
                       lax.broadcasted_iota(jnp.int32, (n_dst, n_e), 0)).astype(f32)
            mask = jnp.dot(dst_ohT, src_oh, preferred_element_type=f32)  # [n_dst, n_src]
            has_edge = mask > 0.0

            # Per-destination softmax over this edge type (PyG HGTConv group='sum').
            for hh in range(H):
                kp_h = kp * head_mask[hh]          # zero out the other head's lanes
                s = jnp.einsum("tc,sc->ts", q_dst, kp_h,
                               preferred_element_type=f32)
                s = jnp.where(has_edge, s, f32(-1e30))
                mx = jnp.max(s, axis=-1, keepdims=True)
                p = jnp.exp(s - mx) * mask
                denom = jnp.sum(p, axis=-1, keepdims=True)
                attn = p / jnp.where(denom > 0.0, denom, 1.0)
                agg[dst] = agg[dst] + jnp.dot(attn, vp * head_mask[hh],
                                              preferred_element_type=f32)

        # GELU -> a_lin -> gated skip (alpha = sigmoid(skip), read from SMEM).
        new_h = {}
        for nt in NODE_TYPES:
            w_ref, b_ref, nt_idx = out_refs[nt]
            sm = agg[nt]
            g = 0.5 * sm * (1.0 + lax.erf(sm * inv_sqrt2))   # exact (erf) GELU
            y = jnp.dot(g, w_ref[layer], preferred_element_type=f32) + b_ref[layer]
            alpha = alpha_ref[layer * len(NODE_TYPES) + nt_idx]
            new_h[nt] = alpha * y + (1.0 - alpha) * h[nt]
        h = new_h

    hq_out_ref[...] = h["question"]
    ha_out_ref[...] = h["answer"]

    # ---- Decoder: pos & neg edge dot-products, computed together ----
    e_tot = cfg["num_pos"] + cfg["num_neg"]
    q_oh = (dec_q_ref[...] ==
            lax.broadcasted_iota(jnp.int32, (e_tot, n_nodes["question"]), 1)).astype(f32)
    a_oh = (dec_a_ref[...] ==
            lax.broadcasted_iota(jnp.int32, (e_tot, n_nodes["answer"]), 1)).astype(f32)
    qf = jnp.dot(q_oh, h["question"], preferred_element_type=f32)   # [E_tot, C]
    af = jnp.dot(a_oh, h["answer"], preferred_element_type=f32)     # [E_tot, C]
    pred_out_ref[...] = jnp.sum(qf * af, axis=-1, keepdims=True)    # [E_tot, 1]


# ---------------------------------------------------------------------------
# Deterministic parameter construction (packed for the fused kernel).
# ---------------------------------------------------------------------------
def _dense_init(key, fan_in, fan_out):
    kw, kb = jax.random.split(key)
    bound = 1.0 / math.sqrt(fan_in)
    w = jax.random.uniform(kw, (fan_in, fan_out), jnp.float32, -bound, bound)
    b = jax.random.uniform(kb, (1, fan_out), jnp.float32, -bound, bound)
    return w, b


def _block_diag(per_head):  # [H, D, D] -> [C, C]
    out = jnp.zeros((CHANNELS, CHANNELS), jnp.float32)
    for hh in range(NUM_HEADS):
        lo = hh * HEAD_DIM
        out = out.at[lo:lo + HEAD_DIM, lo:lo + HEAD_DIM].set(per_head[hh])
    return out


def init_params(key, in_dims):
    params = {"lin": {}, "bn": {}}
    for nt in NODE_TYPES:
        key, k1 = jax.random.split(key)
        params["lin"][nt] = _dense_init(k1, in_dims[nt], CHANNELS)
        params["bn"][nt] = (jnp.ones((1, CHANNELS), jnp.float32),
                            jnp.zeros((1, CHANNELS), jnp.float32))

    w_kqv = {nt: [] for nt in NODE_TYPES}
    b_kqv = {nt: [] for nt in NODE_TYPES}
    w_out = {nt: [] for nt in NODE_TYPES}
    b_out = {nt: [] for nt in NODE_TYPES}
    skip, a_bd, m_bd = [], [], []
    glorot = math.sqrt(6.0 / (2 * HEAD_DIM))
    inv_sqrt_d = 1.0 / math.sqrt(HEAD_DIM)

    for _ in range(NUM_LAYERS):
        for nt in NODE_TYPES:
            ws, bs = [], []
            for _ in range(3):                               # k, q, v fused
                key, k1 = jax.random.split(key)
                w, b = _dense_init(k1, CHANNELS, CHANNELS)
                ws.append(w)
                bs.append(b)
            w_kqv[nt].append(jnp.concatenate(ws, axis=1))    # [C, 3C]
            b_kqv[nt].append(jnp.concatenate(bs, axis=1))    # [1, 3C]
            key, k1 = jax.random.split(key)
            w, b = _dense_init(k1, CHANNELS, CHANNELS)
            w_out[nt].append(w)
            b_out[nt].append(b)
        skip.append(jnp.ones((len(NODE_TYPES),), jnp.float32))   # HGTConv inits skip=1
        for _ in EDGE_TYPES:
            key, k1, k2 = jax.random.split(key, 3)
            a_rel = jax.random.uniform(k1, (NUM_HEADS, HEAD_DIM, HEAD_DIM),
                                       jnp.float32, -glorot, glorot)
            m_rel = jax.random.uniform(k2, (NUM_HEADS, HEAD_DIM, HEAD_DIM),
                                       jnp.float32, -glorot, glorot)
            p_rel = jnp.ones((NUM_HEADS,), jnp.float32)
            # Fold the attention scale p_rel / sqrt(D) into a_rel.
            a_bd.append(_block_diag(a_rel * (p_rel * inv_sqrt_d)[:, None, None]))
            m_bd.append(_block_diag(m_rel))

    params["conv"] = {
        "w_kqv": {nt: jnp.stack(w_kqv[nt]) for nt in NODE_TYPES},   # [L, C, 3C]
        "b_kqv": {nt: jnp.stack(b_kqv[nt]) for nt in NODE_TYPES},   # [L, 1, 3C]
        "w_out": {nt: jnp.stack(w_out[nt]) for nt in NODE_TYPES},   # [L, C, C]
        "b_out": {nt: jnp.stack(b_out[nt]) for nt in NODE_TYPES},   # [L, 1, C]
        "skip": jnp.stack(skip),                                    # [L, 2]
        "a_bd": jnp.stack(a_bd),                                    # [L*4, C, C]
        "m_bd": jnp.stack(m_bd),                                    # [L*4, C, C]
    }
    return params


# ---------------------------------------------------------------------------
# Forward pass: one grid-less pallas_call.
# ---------------------------------------------------------------------------
def medical_hgt_forward(params, x_dict, edge_index_dict,
                        pos_edge_label_index, neg_edge_label_index):
    nq = int(x_dict["question"].shape[0])
    na = int(x_dict["answer"].shape[0])
    conv = params["conv"]
    num_layers = int(conv["a_bd"].shape[0]) // len(EDGE_TYPES)

    # Static edge layout + flattened int32 index vectors (graph is static).
    edge_meta, src_idx, dst_idx = [], [], []
    off = 0
    for et in EDGE_TYPES:
        src_t, _, dst_t = et
        ei = edge_index_dict[et]
        n_e = int(ei.shape[1])
        edge_meta.append((src_t, dst_t, n_e, off))
        src_idx.append(ei[0].astype(jnp.int32))
        dst_idx.append(ei[1].astype(jnp.int32))
        off += n_e
    esrc_col = jnp.concatenate(src_idx).reshape(-1, 1)   # [E_graph, 1]
    edst_row = jnp.concatenate(dst_idx).reshape(1, -1)   # [1, E_graph]

    e_pos = int(pos_edge_label_index.shape[1])
    e_neg = int(neg_edge_label_index.shape[1])
    dec_q = jnp.concatenate([pos_edge_label_index[0],
                             neg_edge_label_index[0]]).astype(jnp.int32).reshape(-1, 1)
    dec_a = jnp.concatenate([pos_edge_label_index[1],
                             neg_edge_label_index[1]]).astype(jnp.int32).reshape(-1, 1)

    alpha = jax.nn.sigmoid(conv["skip"]).reshape(-1)      # [L * num_node_types]

    cfg = dict(channels=CHANNELS, heads=NUM_HEADS, num_layers=num_layers,
               apply_bn=(nq == BATCH_SIZE),
               num_question=nq, num_answer=na,
               edge_types=tuple(edge_meta), num_pos=e_pos, num_neg=e_neg)

    smem = pl.BlockSpec(memory_space=pltpu.MemorySpace.SMEM)
    vmem = pl.BlockSpec(memory_space=pltpu.MemorySpace.VMEM)

    inputs = (
        alpha,
        x_dict["question"], x_dict["answer"],
        params["lin"]["question"][0], params["lin"]["question"][1],
        params["lin"]["answer"][0], params["lin"]["answer"][1],
        params["bn"]["question"][0], params["bn"]["question"][1],
        params["bn"]["answer"][0], params["bn"]["answer"][1],
        conv["w_kqv"]["question"], conv["b_kqv"]["question"],
        conv["w_kqv"]["answer"], conv["b_kqv"]["answer"],
        conv["w_out"]["question"], conv["b_out"]["question"],
        conv["w_out"]["answer"], conv["b_out"]["answer"],
        conv["a_bd"], conv["m_bd"],
        esrc_col, edst_row, dec_q, dec_a,
    )
    in_specs = [smem] + [vmem] * (len(inputs) - 1)

    out_shape = (
        jax.ShapeDtypeStruct((nq, CHANNELS), jnp.float32),
        jax.ShapeDtypeStruct((na, CHANNELS), jnp.float32),
        jax.ShapeDtypeStruct((e_pos + e_neg, 1), jnp.float32),
    )
    out_specs = (vmem, vmem, vmem)

    hq, ha, pred = pl.pallas_call(
        functools.partial(_fused_hgt_kernel, cfg),
        out_shape=out_shape,
        in_specs=in_specs,
        out_specs=out_specs,
    )(*inputs)

    pred = pred.reshape(-1)
    return pred[:e_pos], pred[e_pos:], {"question": hq, "answer": ha}


# ---------------------------------------------------------------------------
if __name__ == "__main__":
    key = jax.random.PRNGKey(0)
    num_question, num_answer = BATCH_SIZE, 2 * BATCH_SIZE
    in_dims = {"question": 24, "answer": 40}

    key, kq, ka, kp = jax.random.split(key, 4)
    x_dict = {
        "question": jax.random.normal(kq, (num_question, in_dims["question"]), jnp.float32),
        "answer": jax.random.normal(ka, (num_answer, in_dims["answer"]), jnp.float32),
    }

    q_idx = jnp.arange(num_question, dtype=jnp.int32)
    correct = jnp.stack([q_idx, 2 * q_idx])        # question i -> answer 2i
    wrong = jnp.stack([q_idx, 2 * q_idx + 1])      # question i -> answer 2i+1
    edge_index_dict = {
        ("question", "question_correct_answer", "answer"): correct,
        ("question", "question_wrong_answer", "answer"): wrong,
        ("answer", "rev_question_correct_answer", "question"): correct[::-1],
        ("answer", "rev_question_wrong_answer", "question"): wrong[::-1],
    }

    params = init_params(kp, in_dims)
    pos_pred, neg_pred, z_dict = medical_hgt_forward(
        params, x_dict, edge_index_dict, correct, wrong)
    jax.block_until_ready((pos_pred, neg_pred, z_dict))

    assert pos_pred.shape == (num_question,)
    assert neg_pred.shape == (num_question,)
    assert z_dict["question"].shape == (num_question, CHANNELS)
    assert z_dict["answer"].shape == (num_answer, CHANNELS)
    assert bool(jnp.all(jnp.isfinite(pos_pred))) and bool(jnp.all(jnp.isfinite(neg_pred)))
    print("KERNEL_OK")
</pallas_src>

<mosaic_0001>
module attributes {stable_mosaic.version = 11 : i64} {
  func.func @_fused_hgt_kernel(%arg0: memref<2xf32, #tpu.memory_space<smem>>, %arg1: memref<8x24xf32, #tpu.memory_space<vmem>>, %arg2: memref<16x40xf32, #tpu.memory_space<vmem>>, %arg3: memref<24x32xf32, #tpu.memory_space<vmem>>, %arg4: memref<1x32xf32, #tpu.memory_space<vmem>>, %arg5: memref<40x32xf32, #tpu.memory_space<vmem>>, %arg6: memref<1x32xf32, #tpu.memory_space<vmem>>, %arg7: memref<1x32xf32, #tpu.memory_space<vmem>>, %arg8: memref<1x32xf32, #tpu.memory_space<vmem>>, %arg9: memref<1x32xf32, #tpu.memory_space<vmem>>, %arg10: memref<1x32xf32, #tpu.memory_space<vmem>>, %arg11: memref<1x32x96xf32, #tpu.memory_space<vmem>>, %arg12: memref<1x1x96xf32, #tpu.memory_space<vmem>>, %arg13: memref<1x32x96xf32, #tpu.memory_space<vmem>>, %arg14: memref<1x1x96xf32, #tpu.memory_space<vmem>>, %arg15: memref<1x32x32xf32, #tpu.memory_space<vmem>>, %arg16: memref<1x1x32xf32, #tpu.memory_space<vmem>>, %arg17: memref<1x32x32xf32, #tpu.memory_space<vmem>>, %arg18: memref<1x1x32xf32, #tpu.memory_space<vmem>>, %arg19: memref<4x32x32xf32, #tpu.memory_space<vmem>>, %arg20: memref<4x32x32xf32, #tpu.memory_space<vmem>>, %arg21: memref<32x1xi32, #tpu.memory_space<vmem>>, %arg22: memref<1x32xi32, #tpu.memory_space<vmem>>, %arg23: memref<16x1xi32, #tpu.memory_space<vmem>>, %arg24: memref<16x1xi32, #tpu.memory_space<vmem>>, %arg25: memref<8x32xf32, #tpu.memory_space<vmem>>, %arg26: memref<16x32xf32, #tpu.memory_space<vmem>>, %arg27: memref<16x1xf32, #tpu.memory_space<vmem>>) attributes {dimension_semantics = [], scalar_prefetch = 0 : i64, scratch_operands = 0 : i64, tpu.core_type = #tpu.core_type<tc>} {
    %c0 = arith.constant 0 : index
    %c0_0 = arith.constant 0 : index
    %0 = vector.load %arg1[%c0, %c0_0] : memref<8x24xf32, #tpu.memory_space<vmem>>, vector<8x24xf32>
    %c0_1 = arith.constant 0 : index
    %c0_2 = arith.constant 0 : index
    %1 = vector.load %arg3[%c0_1, %c0_2] : memref<24x32xf32, #tpu.memory_space<vmem>>, vector<24x32xf32>
    %c0_3 = arith.constant 0 : index
    %c0_4 = arith.constant 0 : index
    %2 = vector.load %arg4[%c0_3, %c0_4] : memref<1x32xf32, #tpu.memory_space<vmem>>, vector<1x32xf32>
    %c0_5 = arith.constant 0 : index
    %c0_6 = arith.constant 0 : index
    %3 = vector.load %arg7[%c0_5, %c0_6] : memref<1x32xf32, #tpu.memory_space<vmem>>, vector<1x32xf32>
    %c0_7 = arith.constant 0 : index
    %c0_8 = arith.constant 0 : index
    %4 = vector.load %arg8[%c0_7, %c0_8] : memref<1x32xf32, #tpu.memory_space<vmem>>, vector<1x32xf32>
    %cst = arith.constant dense<0.000000e+00> : vector<8x32xf32>
    %5 = tpu.matmul %0, %1, %cst {dimension_numbers = #tpu.dot_dimension_numbers<[1], [0], [0], [1], [0, 0, 1, 1], [], []>} : vector<8x24xf32>, vector<24x32xf32>, vector<8x32xf32> -> vector<8x32xf32>
    %6 = vector.broadcast %2 : vector<1x32xf32> to vector<8x32xf32>
    %7 = arith.addf %5, %6 : vector<8x32xf32>
    %cst_9 = arith.constant 0.000000e+00 : f32
    %8 = vector.broadcast %cst_9 : f32 to vector<8x32xf32>
    %9 = arith.maximumf %7, %8 : vector<8x32xf32>
    %cst_10 = arith.constant dense<0.000000e+00> : vector<32xf32>
    %10 = vector.multi_reduction <add>, %9, %cst_10 [0] : vector<8x32xf32> to vector<32xf32>
    %11 = vector.shape_cast %10 : vector<32xf32> to vector<1x32xf32>
    %cst_11 = arith.constant 8.000000e+00 : f32
    %12 = vector.broadcast %cst_11 : f32 to vector<1x32xf32>
    %13 = arith.divf %11, %12 : vector<1x32xf32>
    %14 = vector.broadcast %13 : vector<1x32xf32> to vector<8x32xf32>
    %15 = arith.subf %9, %14 : vector<8x32xf32>
    %16 = arith.mulf %15, %15 : vector<8x32xf32>
    %cst_12 = arith.constant dense<0.000000e+00> : vector<32xf32>
    %17 = vector.multi_reduction <add>, %16, %cst_12 [0] : vector<8x32xf32> to vector<32xf32>
    %18 = vector.shape_cast %17 : vector<32xf32> to vector<1x32xf32>
    %cst_13 = arith.constant 8.000000e+00 : f32
    %19 = vector.broadcast %cst_13 : f32 to vector<1x32xf32>
    %20 = arith.divf %18, %19 : vector<1x32xf32>
    %21 = vector.broadcast %13 : vector<1x32xf32> to vector<8x32xf32>
    %22 = arith.subf %9, %21 : vector<8x32xf32>
    %cst_14 = arith.constant 9.99999974E-6 : f32
    %23 = vector.broadcast %cst_14 : f32 to vector<1x32xf32>
    %24 = arith.addf %20, %23 : vector<1x32xf32>
    %25 = math.rsqrt %24 : vector<1x32xf32>
    %26 = vector.broadcast %25 : vector<1x32xf32> to vector<8x32xf32>
    %27 = arith.mulf %22, %26 : vector<8x32xf32>
    %28 = vector.broadcast %3 : vector<1x32xf32> to vector<8x32xf32>
    %29 = arith.mulf %27, %28 : vector<8x32xf32>
    %30 = vector.broadcast %4 : vector<1x32xf32> to vector<8x32xf32>
    %31 = arith.addf %29, %30 : vector<8x32xf32>
    %c0_15 = arith.constant 0 : index
    %c0_16 = arith.constant 0 : index
    %32 = vector.load %arg2[%c0_15, %c0_16] : memref<16x40xf32, #tpu.memory_space<vmem>>, vector<16x40xf32>
    %c0_17 = arith.constant 0 : index
    %c0_18 = arith.constant 0 : index
    %33 = vector.load %arg5[%c0_17, %c0_18] : memref<40x32xf32, #tpu.memory_space<vmem>>, vector<40x32xf32>
    %c0_19 = arith.constant 0 : index
    %c0_20 = arith.constant 0 : index
    %34 = vector.load %arg6[%c0_19, %c0_20] : memref<1x32xf32, #tpu.memory_space<vmem>>, vector<1x32xf32>
    %c0_21 = arith.constant 0 : index
    %c0_22 = arith.constant 0 : index
    %35 = vector.load %arg9[%c0_21, %c0_22] : memref<1x32xf32, #tpu.memory_space<vmem>>, vector<1x32xf32>
    %c0_23 = arith.constant 0 : index
    %c0_24 = arith.constant 0 : index
    %36 = vector.load %arg10[%c0_23, %c0_24] : memref<1x32xf32, #tpu.memory_space<vmem>>, vector<1x32xf32>
    %cst_25 = arith.constant dense<0.000000e+00> : vector<16x32xf32>
    %37 = tpu.matmul %32, %33, %cst_25 {dimension_numbers = #tpu.dot_dimension_numbers<[1], [0], [0], [1], [0, 0, 1, 1], [], []>} : vector<16x40xf32>, vector<40x32xf32>, vector<16x32xf32> -> vector<16x32xf32>
    %38 = vector.broadcast %34 : vector<1x32xf32> to vector<16x32xf32>
    %39 = arith.addf %37, %38 : vector<16x32xf32>
    %cst_26 = arith.constant 0.000000e+00 : f32
    %40 = vector.broadcast %cst_26 : f32 to vector<16x32xf32>
    %41 = arith.maximumf %39, %40 : vector<16x32xf32>
    %cst_27 = arith.constant dense<0.000000e+00> : vector<32xf32>
    %42 = vector.multi_reduction <add>, %41, %cst_27 [0] : vector<16x32xf32> to vector<32xf32>
    %43 = vector.shape_cast %42 : vector<32xf32> to vector<1x32xf32>
    %cst_28 = arith.constant 1.600000e+01 : f32
    %44 = vector.broadcast %cst_28 : f32 to vector<1x32xf32>
    %45 = arith.divf %43, %44 : vector<1x32xf32>
    %46 = vector.broadcast %45 : vector<1x32xf32> to vector<16x32xf32>
    %47 = arith.subf %41, %46 : vector<16x32xf32>
    %48 = arith.mulf %47, %47 : vector<16x32xf32>
    %cst_29 = arith.constant dense<0.000000e+00> : vector<32xf32>
    %49 = vector.multi_reduction <add>, %48, %cst_29 [0] : vector<16x32xf32> to vector<32xf32>
    %50 = vector.shape_cast %49 : vector<32xf32> to vector<1x32xf32>
    %cst_30 = arith.constant 1.600000e+01 : f32
    %51 = vector.broadcast %cst_30 : f32 to vector<1x32xf32>
    %52 = arith.divf %50, %51 : vector<1x32xf32>
    %53 = vector.broadcast %45 : vector<1x32xf32> to vector<16x32xf32>
    %54 = arith.subf %41, %53 : vector<16x32xf32>
    %cst_31 = arith.constant 9.99999974E-6 : f32
    %55 = vector.broadcast %cst_31 : f32 to vector<1x32xf32>
    %56 = arith.addf %52, %55 : vector<1x32xf32>
    %57 = math.rsqrt %56 : vector<1x32xf32>
    %58 = vector.broadcast %57 : vector<1x32xf32> to vector<16x32xf32>
    %59 = arith.mulf %54, %58 : vector<16x32xf32>
    %60 = vector.broadcast %35 : vector<1x32xf32> to vector<16x32xf32>
    %61 = arith.mulf %59, %60 : vector<16x32xf32>
    %62 = vector.broadcast %36 : vector<1x32xf32> to vector<16x32xf32>
    %63 = arith.addf %61, %62 : vector<16x32xf32>
    %64 = tpu.iota {dimensions = array<i32: 1>} : vector<1x32xi32>
    %c0_i32 = arith.constant 0 : i32
    %65 = vector.broadcast %c0_i32 : i32 to vector<1x32xi32>
    %66 = arith.cmpi sge, %64, %65 : vector<1x32xi32>
    %c16_i32 = arith.constant 16 : i32
    %67 = vector.broadcast %c16_i32 : i32 to vector<1x32xi32>
    %68 = arith.cmpi slt, %64, %67 : vector<1x32xi32>
    %69 = arith.andi %66, %68 : vector<1x32xi1>
    %70 = arith.extui %69 : vector<1x32xi1> to vector<1x32xi32>
    %71 = arith.sitofp %70 : vector<1x32xi32> to vector<1x32xf32>
    %c16_i32_32 = arith.constant 16 : i32
    %72 = vector.broadcast %c16_i32_32 : i32 to vector<1x32xi32>
    %73 = arith.cmpi sge, %64, %72 : vector<1x32xi32>
    %c32_i32 = arith.constant 32 : i32
    %74 = vector.broadcast %c32_i32 : i32 to vector<1x32xi32>
    %75 = arith.cmpi slt, %64, %74 : vector<1x32xi32>
    %76 = arith.andi %73, %75 : vector<1x32xi1>
    %77 = arith.extui %76 : vector<1x32xi1> to vector<1x32xi32>
    %78 = arith.sitofp %77 : vector<1x32xi32> to vector<1x32xf32>
    %c0_33 = arith.constant 0 : index
    %c0_34 = arith.constant 0 : index
    %c0_35 = arith.constant 0 : index
    %79 = vector.load %arg11[%c0_33, %c0_34, %c0_35] : memref<1x32x96xf32, #tpu.memory_space<vmem>>, vector<1x32x96xf32>
    %80 = vector.shape_cast %79 : vector<1x32x96xf32> to vector<32x96xf32>
    %cst_36 = arith.constant dense<0.000000e+00> : vector<8x96xf32>
    %81 = tpu.matmul %31, %80, %cst_36 {dimension_numbers = #tpu.dot_dimension_numbers<[1], [0], [0], [1], [0, 0, 1, 1], [], []>} : vector<8x32xf32>, vector<32x96xf32>, vector<8x96xf32> -> vector<8x96xf32>
    %c0_37 = arith.constant 0 : index
    %c0_38 = arith.constant 0 : index
    %c0_39 = arith.constant 0 : index
    %82 = vector.load %arg12[%c0_37, %c0_38, %c0_39] : memref<1x1x96xf32, #tpu.memory_space<vmem>>, vector<1x1x96xf32>
    %83 = vector.shape_cast %82 : vector<1x1x96xf32> to vector<1x96xf32>
    %84 = vector.broadcast %83 : vector<1x96xf32> to vector<8x96xf32>
    %85 = arith.addf %81, %84 : vector<8x96xf32>
    %86 = vector.extract_strided_slice %85 {offsets = [0, 0], sizes = [8, 32], strides = [1, 1]} : vector<8x96xf32> to vector<8x32xf32>
    %87 = vector.extract_strided_slice %85 {offsets = [0, 32], sizes = [8, 32], strides = [1, 1]} : vector<8x96xf32> to vector<8x32xf32>
    %88 = vector.extract_strided_slice %85 {offsets = [0, 64], sizes = [8, 32], strides = [1, 1]} : vector<8x96xf32> to vector<8x32xf32>
    %c0_40 = arith.constant 0 : index
    %c0_41 = arith.constant 0 : index
    %c0_42 = arith.constant 0 : index
    %89 = vector.load %arg13[%c0_40, %c0_41, %c0_42] : memref<1x32x96xf32, #tpu.memory_space<vmem>>, vector<1x32x96xf32>
    %90 = vector.shape_cast %89 : vector<1x32x96xf32> to vector<32x96xf32>
    %cst_43 = arith.constant dense<0.000000e+00> : vector<16x96xf32>
    %91 = tpu.matmul %63, %90, %cst_43 {dimension_numbers = #tpu.dot_dimension_numbers<[1], [0], [0], [1], [0, 0, 1, 1], [], []>} : vector<16x32xf32>, vector<32x96xf32>, vector<16x96xf32> -> vector<16x96xf32>
    %c0_44 = arith.constant 0 : index
    %c0_45 = arith.constant 0 : index
    %c0_46 = arith.constant 0 : index
    %92 = vector.load %arg14[%c0_44, %c0_45, %c0_46] : memref<1x1x96xf32, #tpu.memory_space<vmem>>, vector<1x1x96xf32>
    %93 = vector.shape_cast %92 : vector<1x1x96xf32> to vector<1x96xf32>
    %94 = vector.broadcast %93 : vector<1x96xf32> to vector<16x96xf32>
    %95 = arith.addf %91, %94 : vector<16x96xf32>
    %96 = vector.extract_strided_slice %95 {offsets = [0, 0], sizes = [16, 32], strides = [1, 1]} : vector<16x96xf32> to vector<16x32xf32>
    %97 = vector.extract_strided_slice %95 {offsets = [0, 32], sizes = [16, 32], strides = [1, 1]} : vector<16x96xf32> to vector<16x32xf32>
    %98 = vector.extract_strided_slice %95 {offsets = [0, 64], sizes = [16, 32], strides = [1, 1]} : vector<16x96xf32> to vector<16x32xf32>
    %cst_47 = arith.constant 0.000000e+00 : f32
    %99 = vector.broadcast %cst_47 : f32 to vector<8x32xf32>
    %cst_48 = arith.constant 0.000000e+00 : f32
    %100 = vector.broadcast %cst_48 : f32 to vector<16x32xf32>
    %c0_49 = arith.constant 0 : index
    %c0_50 = arith.constant 0 : index
    %c0_51 = arith.constant 0 : index
    %101 = vector.load %arg19[%c0_49, %c0_50, %c0_51] : memref<4x32x32xf32, #tpu.memory_space<vmem>>, vector<1x32x32xf32>
    %102 = vector.shape_cast %101 : vector<1x32x32xf32> to vector<32x32xf32>
    %cst_52 = arith.constant dense<0.000000e+00> : vector<8x32xf32>
    %103 = tpu.matmul %86, %102, %cst_52 {dimension_numbers = #tpu.dot_dimension_numbers<[1], [0], [0], [1], [0, 0, 1, 1], [], []>} : vector<8x32xf32>, vector<32x32xf32>, vector<8x32xf32> -> vector<8x32xf32>
    %c0_53 = arith.constant 0 : index
    %c0_54 = arith.constant 0 : index
    %c0_55 = arith.constant 0 : index
    %104 = vector.load %arg20[%c0_53, %c0_54, %c0_55] : memref<4x32x32xf32, #tpu.memory_space<vmem>>, vector<1x32x32xf32>
    %105 = vector.shape_cast %104 : vector<1x32x32xf32> to vector<32x32xf32>
    %cst_56 = arith.constant dense<0.000000e+00> : vector<8x32xf32>
    %106 = tpu.matmul %88, %105, %cst_56 {dimension_numbers = #tpu.dot_dimension_numbers<[1], [0], [0], [1], [0, 0, 1, 1], [], []>} : vector<8x32xf32>, vector<32x32xf32>, vector<8x32xf32> -> vector<8x32xf32>
    %c0_57 = arith.constant 0 : index
    %c0_58 = arith.constant 0 : index
    %107 = vector.load %arg21[%c0_57, %c0_58] : memref<32x1xi32, #tpu.memory_space<vmem>>, vector<8x1xi32>
    %108 = tpu.iota {dimensions = array<i32: 1>} : vector<8x8xi32>
    %109 = vector.broadcast %107 : vector<8x1xi32> to vector<8x8xi32>
    %110 = arith.cmpi eq, %109, %108 : vector<8x8xi32>
    %111 = arith.extui %110 : vector<8x8xi1> to vector<8x8xi32>
    %112 = arith.sitofp %111 : vector<8x8xi32> to vector<8x8xf32>
    %c0_59 = arith.constant 0 : index
    %c0_60 = arith.constant 0 : index
    %113 = vector.load %arg22[%c0_59, %c0_60] : memref<1x32xi32, #tpu.memory_space<vmem>>, vector<1x8xi32>
    %114 = tpu.iota {dimensions = array<i32: 0>} : vector<16x8xi32>
    %115 = vector.broadcast %113 : vector<1x8xi32> to vector<16x8xi32>
    %116 = arith.cmpi eq, %115, %114 : vector<16x8xi32>
    %117 = arith.extui %116 : vector<16x8xi1> to vector<16x8xi32>
    %118 = arith.sitofp %117 : vector<16x8xi32> to vector<16x8xf32>
    %cst_61 = arith.constant dense<0.000000e+00> : vector<16x8xf32>
    %119 = tpu.matmul %118, %112, %cst_61 {dimension_numbers = #tpu.dot_dimension_numbers<[1], [0], [0], [1], [0, 0, 1, 1], [], []>} : vector<16x8xf32>, vector<8x8xf32>, vector<16x8xf32> -> vector<16x8xf32>
    %cst_62 = arith.constant 0.000000e+00 : f32
    %120 = vector.broadcast %cst_62 : f32 to vector<16x8xf32>
    %121 = arith.cmpf ogt, %119, %120 : vector<16x8xf32>
    %122 = vector.broadcast %71 : vector<1x32xf32> to vector<8x32xf32>
    %123 = arith.mulf %103, %122 : vector<8x32xf32>
    "tpu.trace_start"() <{level = 10 : i32, message = "tc,sc->ts"}> : () -> ()
    %cst_63 = arith.constant dense<0.000000e+00> : vector<16x8xf32>
    %124 = tpu.matmul %97, %123, %cst_63 {dimension_numbers = #tpu.dot_dimension_numbers<[1], [1], [0], [0], [0, 0, 1, 0], [], []>} : vector<16x32xf32>, vector<8x32xf32>, vector<16x8xf32> -> vector<16x8xf32>
    %cst_64 = arith.constant -1.000000e+30 : f32
    "tpu.trace_stop"() : () -> ()
    %125 = vector.broadcast %cst_64 : f32 to vector<16x8xf32>
    %126 = arith.select %121, %124, %125 : vector<16x8xi1>, vector<16x8xf32>
    %cst_65 = arith.constant dense<0xFF800000> : vector<16xf32>
    %127 = vector.multi_reduction <maximumf>, %126, %cst_65 [1] : vector<16x8xf32> to vector<16xf32>
    %128 = vector.shape_cast %127 : vector<16xf32> to vector<16x1xf32>
    %129 = vector.broadcast %128 : vector<16x1xf32> to vector<16x8xf32>
    %130 = arith.subf %126, %129 : vector<16x8xf32>
    %131 = math.exp %130 : vector<16x8xf32>
    %132 = arith.mulf %131, %119 : vector<16x8xf32>
    %cst_66 = arith.constant dense<0.000000e+00> : vector<16xf32>
    %133 = vector.multi_reduction <add>, %132, %cst_66 [1] : vector<16x8xf32> to vector<16xf32>
    %134 = vector.shape_cast %133 : vector<16xf32> to vector<16x1xf32>
    %cst_67 = arith.constant 0.000000e+00 : f32
    %135 = vector.broadcast %cst_67 : f32 to vector<16x1xf32>
    %136 = arith.cmpf ogt, %134, %135 : vector<16x1xf32>
    %cst_68 = arith.constant 1.000000e+00 : f32
    %137 = vector.broadcast %cst_68 : f32 to vector<16x1xf32>
    %138 = arith.select %136, %134, %137 : vector<16x1xi1>, vector<16x1xf32>
    %139 = vector.broadcast %138 : vector<16x1xf32> to vector<16x8xf32>
    %140 = arith.divf %132, %139 : vector<16x8xf32>
    %141 = vector.broadcast %71 : vector<1x32xf32> to vector<8x32xf32>
    %142 = arith.mulf %106, %141 : vector<8x32xf32>
    %cst_69 = arith.constant dense<0.000000e+00> : vector<16x32xf32>
    %143 = tpu.matmul %140, %142, %cst_69 {dimension_numbers = #tpu.dot_dimension_numbers<[1], [0], [0], [1], [0, 0, 1, 1], [], []>} : vector<16x8xf32>, vector<8x32xf32>, vector<16x32xf32> -> vector<16x32xf32>
    %144 = arith.addf %100, %143 : vector<16x32xf32>
    %145 = vector.broadcast %78 : vector<1x32xf32> to vector<8x32xf32>
    %146 = arith.mulf %103, %145 : vector<8x32xf32>
    "tpu.trace_start"() <{level = 10 : i32, message = "tc,sc->ts"}> : () -> ()
    %cst_70 = arith.constant dense<0.000000e+00> : vector<16x8xf32>
    %147 = tpu.matmul %97, %146, %cst_70 {dimension_numbers = #tpu.dot_dimension_numbers<[1], [1], [0], [0], [0, 0, 1, 0], [], []>} : vector<16x32xf32>, vector<8x32xf32>, vector<16x8xf32> -> vector<16x8xf32>
    %cst_71 = arith.constant -1.000000e+30 : f32
    "tpu.trace_stop"() : () -> ()
    %148 = vector.broadcast %cst_71 : f32 to vector<16x8xf32>
    %149 = arith.select %121, %147, %148 : vector<16x8xi1>, vector<16x8xf32>
    %cst_72 = arith.constant dense<0xFF800000> : vector<16xf32>
    %150 = vector.multi_reduction <maximumf>, %149, %cst_72 [1] : vector<16x8xf32> to vector<16xf32>
    %151 = vector.shape_cast %150 : vector<16xf32> to vector<16x1xf32>
    %152 = vector.broadcast %151 : vector<16x1xf32> to vector<16x8xf32>
    %153 = arith.subf %149, %152 : vector<16x8xf32>
    %154 = math.exp %153 : vector<16x8xf32>
    %155 = arith.mulf %154, %119 : vector<16x8xf32>
    %cst_73 = arith.constant dense<0.000000e+00> : vector<16xf32>
    %156 = vector.multi_reduction <add>, %155, %cst_73 [1] : vector<16x8xf32> to vector<16xf32>
    %157 = vector.shape_cast %156 : vector<16xf32> to vector<16x1xf32>
    %cst_74 = arith.constant 0.000000e+00 : f32
    %158 = vector.broadcast %cst_74 : f32 to vector<16x1xf32>
    %159 = arith.cmpf ogt, %157, %158 : vector<16x1xf32>
    %cst_75 = arith.constant 1.000000e+00 : f32
    %160 = vector.broadcast %cst_75 : f32 to vector<16x1xf32>
    %161 = arith.select %159, %157, %160 : vector<16x1xi1>, vector<16x1xf32>
    %162 = vector.broadcast %161 : vector<16x1xf32> to vector<16x8xf32>
    %163 = arith.divf %155, %162 : vector<16x8xf32>
    %164 = vector.broadcast %78 : vector<1x32xf32> to vector<8x32xf32>
    %165 = arith.mulf %106, %164 : vector<8x32xf32>
    %cst_76 = arith.constant dense<0.000000e+00> : vector<16x32xf32>
    %166 = tpu.matmul %163, %165, %cst_76 {dimension_numbers = #tpu.dot_dimension_numbers<[1], [0], [0], [1], [0, 0, 1, 1], [], []>} : vector<16x8xf32>, vector<8x32xf32>, vector<16x32xf32> -> vector<16x32xf32>
    %167 = arith.addf %144, %166 : vector<16x32xf32>
    %c1 = arith.constant 1 : index
    %c0_77 = arith.constant 0 : index
    %c0_78 = arith.constant 0 : index
    %168 = vector.load %arg19[%c1, %c0_77, %c0_78] : memref<4x32x32xf32, #tpu.memory_space<vmem>>, vector<1x32x32xf32>
    %169 = vector.shape_cast %168 : vector<1x32x32xf32> to vector<32x32xf32>
    %cst_79 = arith.constant dense<0.000000e+00> : vector<8x32xf32>
    %170 = tpu.matmul %86, %169, %cst_79 {dimension_numbers = #tpu.dot_dimension_numbers<[1], [0], [0], [1], [0, 0, 1, 1], [], []>} : vector<8x32xf32>, vector<32x32xf32>, vector<8x32xf32> -> vector<8x32xf32>
    %c1_80 = arith.constant 1 : index
    %c0_81 = arith.constant 0 : index
    %c0_82 = arith.constant 0 : index
    %171 = vector.load %arg20[%c1_80, %c0_81, %c0_82] : memref<4x32x32xf32, #tpu.memory_space<vmem>>, vector<1x32x32xf32>
    %172 = vector.shape_cast %171 : vector<1x32x32xf32> to vector<32x32xf32>
    %cst_83 = arith.constant dense<0.000000e+00> : vector<8x32xf32>
    %173 = tpu.matmul %88, %172, %cst_83 {dimension_numbers = #tpu.dot_dimension_numbers<[1], [0], [0], [1], [0, 0, 1, 1], [], []>} : vector<8x32xf32>, vector<32x32xf32>, vector<8x32xf32> -> vector<8x32xf32>
    %c8 = arith.constant 8 : index
    %c0_84 = arith.constant 0 : index
    %174 = vector.load %arg21[%c8, %c0_84] : memref<32x1xi32, #tpu.memory_space<vmem>>, vector<8x1xi32>
    %175 = tpu.iota {dimensions = array<i32: 1>} : vector<8x8xi32>
    %176 = vector.broadcast %174 : vector<8x1xi32> to vector<8x8xi32>
    %177 = arith.cmpi eq, %176, %175 : vector<8x8xi32>
    %178 = arith.extui %177 : vector<8x8xi1> to vector<8x8xi32>
    %179 = arith.sitofp %178 : vector<8x8xi32> to vector<8x8xf32>
    %c0_85 = arith.constant 0 : index
    %c8_86 = arith.constant 8 : index
    %180 = vector.load %arg22[%c0_85, %c8_86] : memref<1x32xi32, #tpu.memory_space<vmem>>, vector<1x8xi32>
    %181 = tpu.iota {dimensions = array<i32: 0>} : vector<16x8xi32>
    %182 = vector.broadcast %180 : vector<1x8xi32> to vector<16x8xi32>
    %183 = arith.cmpi eq, %182, %181 : vector<16x8xi32>
    %184 = arith.extui %183 : vector<16x8xi1> to vector<16x8xi32>
    %185 = arith.sitofp %184 : vector<16x8xi32> to vector<16x8xf32>
    %cst_87 = arith.constant dense<0.000000e+00> : vector<16x8xf32>
    %186 = tpu.matmul %185, %179, %cst_87 {dimension_numbers = #tpu.dot_dimension_numbers<[1], [0], [0], [1], [0, 0, 1, 1], [], []>} : vector<16x8xf32>, vector<8x8xf32>, vector<16x8xf32> -> vector<16x8xf32>
    %cst_88 = arith.constant 0.000000e+00 : f32
    %187 = vector.broadcast %cst_88 : f32 to vector<16x8xf32>
    %188 = arith.cmpf ogt, %186, %187 : vector<16x8xf32>
    %189 = vector.broadcast %71 : vector<1x32xf32> to vector<8x32xf32>
    %190 = arith.mulf %170, %189 : vector<8x32xf32>
    "tpu.trace_start"() <{level = 10 : i32, message = "tc,sc->ts"}> : () -> ()
    %cst_89 = arith.constant dense<0.000000e+00> : vector<16x8xf32>
    %191 = tpu.matmul %97, %190, %cst_89 {dimension_numbers = #tpu.dot_dimension_numbers<[1], [1], [0], [0], [0, 0, 1, 0], [], []>} : vector<16x32xf32>, vector<8x32xf32>, vector<16x8xf32> -> vector<16x8xf32>
    %cst_90 = arith.constant -1.000000e+30 : f32
    "tpu.trace_stop"() : () -> ()
    %192 = vector.broadcast %cst_90 : f32 to vector<16x8xf32>
    %193 = arith.select %188, %191, %192 : vector<16x8xi1>, vector<16x8xf32>
    %cst_91 = arith.constant dense<0xFF800000> : vector<16xf32>
    %194 = vector.multi_reduction <maximumf>, %193, %cst_91 [1] : vector<16x8xf32> to vector<16xf32>
    %195 = vector.shape_cast %194 : vector<16xf32> to vector<16x1xf32>
    %196 = vector.broadcast %195 : vector<16x1xf32> to vector<16x8xf32>
    %197 = arith.subf %193, %196 : vector<16x8xf32>
    %198 = math.exp %197 : vector<16x8xf32>
    %199 = arith.mulf %198, %186 : vector<16x8xf32>
    %cst_92 = arith.constant dense<0.000000e+00> : vector<16xf32>
    %200 = vector.multi_reduction <add>, %199, %cst_92 [1] : vector<16x8xf32> to vector<16xf32>
    %201 = vector.shape_cast %200 : vector<16xf32> to vector<16x1xf32>
    %cst_93 = arith.constant 0.000000e+00 : f32
    %202 = vector.broadcast %cst_93 : f32 to vector<16x1xf32>
    %203 = arith.cmpf ogt, %201, %202 : vector<16x1xf32>
    %cst_94 = arith.constant 1.000000e+00 : f32
    %204 = vector.broadcast %cst_94 : f32 to vector<16x1xf32>
    %205 = arith.select %203, %201, %204 : vector<16x1xi1>, vector<16x1xf32>
    %206 = vector.broadcast %205 : vector<16x1xf32> to vector<16x8xf32>
    %207 = arith.divf %199, %206 : vector<16x8xf32>
    %208 = vector.broadcast %71 : vector<1x32xf32> to vector<8x32xf32>
    %209 = arith.mulf %173, %208 : vector<8x32xf32>
    %cst_95 = arith.constant dense<0.000000e+00> : vector<16x32xf32>
    %210 = tpu.matmul %207, %209, %cst_95 {dimension_numbers = #tpu.dot_dimension_numbers<[1], [0], [0], [1], [0, 0, 1, 1], [], []>} : vector<16x8xf32>, vector<8x32xf32>, vector<16x32xf32> -> vector<16x32xf32>
    %211 = arith.addf %167, %210 : vector<16x32xf32>
    %212 = vector.broadcast %78 : vector<1x32xf32> to vector<8x32xf32>
    %213 = arith.mulf %170, %212 : vector<8x32xf32>
    "tpu.trace_start"() <{level = 10 : i32, message = "tc,sc->ts"}> : () -> ()
    %cst_96 = arith.constant dense<0.000000e+00> : vector<16x8xf32>
    %214 = tpu.matmul %97, %213, %cst_96 {dimension_numbers = #tpu.dot_dimension_numbers<[1], [1], [0], [0], [0, 0, 1, 0], [], []>} : vector<16x32xf32>, vector<8x32xf32>, vector<16x8xf32> -> vector<16x8xf32>
    %cst_97 = arith.constant -1.000000e+30 : f32
    "tpu.trace_stop"() : () -> ()
    %215 = vector.broadcast %cst_97 : f32 to vector<16x8xf32>
    %216 = arith.select %188, %214, %215 : vector<16x8xi1>, vector<16x8xf32>
    %cst_98 = arith.constant dense<0xFF800000> : vector<16xf32>
    %217 = vector.multi_reduction <maximumf>, %216, %cst_98 [1] : vector<16x8xf32> to vector<16xf32>
    %218 = vector.shape_cast %217 : vector<16xf32> to vector<16x1xf32>
    %219 = vector.broadcast %218 : vector<16x1xf32> to vector<16x8xf32>
    %220 = arith.subf %216, %219 : vector<16x8xf32>
    %221 = math.exp %220 : vector<16x8xf32>
    %222 = arith.mulf %221, %186 : vector<16x8xf32>
    %cst_99 = arith.constant dense<0.000000e+00> : vector<16xf32>
    %223 = vector.multi_reduction <add>, %222, %cst_99 [1] : vector<16x8xf32> to vector<16xf32>
    %224 = vector.shape_cast %223 : vector<16xf32> to vector<16x1xf32>
    %cst_100 = arith.constant 0.000000e+00 : f32
    %225 = vector.broadcast %cst_100 : f32 to vector<16x1xf32>
    %226 = arith.cmpf ogt, %224, %225 : vector<16x1xf32>
    %cst_101 = arith.constant 1.000000e+00 : f32
    %227 = vector.broadcast %cst_101 : f32 to vector<16x1xf32>
    %228 = arith.select %226, %224, %227 : vector<16x1xi1>, vector<16x1xf32>
    %229 = vector.broadcast %228 : vector<16x1xf32> to vector<16x8xf32>
    %230 = arith.divf %222, %229 : vector<16x8xf32>
    %231 = vector.broadcast %78 : vector<1x32xf32> to vector<8x32xf32>
    %232 = arith.mulf %173, %231 : vector<8x32xf32>
    %cst_102 = arith.constant dense<0.000000e+00> : vector<16x32xf32>
    %233 = tpu.matmul %230, %232, %cst_102 {dimension_numbers = #tpu.dot_dimension_numbers<[1], [0], [0], [1], [0, 0, 1, 1], [], []>} : vector<16x8xf32>, vector<8x32xf32>, vector<16x32xf32> -> vector<16x32xf32>
    %234 = arith.addf %211, %233 : vector<16x32xf32>
    %c2 = arith.constant 2 : index
    %c0_103 = arith.constant 0 : index
    %c0_104 = arith.constant 0 : index
    %235 = vector.load %arg19[%c2, %c0_103, %c0_104] : memref<4x32x32xf32, #tpu.memory_space<vmem>>, vector<1x32x32xf32>
    %236 = vector.shape_cast %235 : vector<1x32x32xf32> to vector<32x32xf32>
    %cst_105 = arith.constant dense<0.000000e+00> : vector<16x32xf32>
    %237 = tpu.matmul %96, %236, %cst_105 {dimension_numbers = #tpu.dot_dimension_numbers<[1], [0], [0], [1], [0, 0, 1, 1], [], []>} : vector<16x32xf32>, vector<32x32xf32>, vector<16x32xf32> -> vector<16x32xf32>
    %c2_106 = arith.constant 2 : index
    %c0_107 = arith.constant 0 : index
    %c0_108 = arith.constant 0 : index
    %238 = vector.load %arg20[%c2_106, %c0_107, %c0_108] : memref<4x32x32xf32, #tpu.memory_space<vmem>>, vector<1x32x32xf32>
    %239 = vector.shape_cast %238 : vector<1x32x32xf32> to vector<32x32xf32>
    %cst_109 = arith.constant dense<0.000000e+00> : vector<16x32xf32>
    %240 = tpu.matmul %98, %239, %cst_109 {dimension_numbers = #tpu.dot_dimension_numbers<[1], [0], [0], [1], [0, 0, 1, 1], [], []>} : vector<16x32xf32>, vector<32x32xf32>, vector<16x32xf32> -> vector<16x32xf32>
    %c16 = arith.constant 16 : index
    %c0_110 = arith.constant 0 : index
    %241 = vector.load %arg21[%c16, %c0_110] : memref<32x1xi32, #tpu.memory_space<vmem>>, vector<8x1xi32>
    %242 = tpu.iota {dimensions = array<i32: 1>} : vector<8x16xi32>
    %243 = vector.broadcast %241 : vector<8x1xi32> to vector<8x16xi32>
    %244 = arith.cmpi eq, %243, %242 : vector<8x16xi32>
    %245 = arith.extui %244 : vector<8x16xi1> to vector<8x16xi32>
    %246 = arith.sitofp %245 : vector<8x16xi32> to vector<8x16xf32>
    %c0_111 = arith.constant 0 : index
    %c16_112 = arith.constant 16 : index
    %247 = vector.load %arg22[%c0_111, %c16_112] : memref<1x32xi32, #tpu.memory_space<vmem>>, vector<1x8xi32>
    %248 = tpu.iota {dimensions = array<i32: 0>} : vector<8x8xi32>
    %249 = vector.broadcast %247 : vector<1x8xi32> to vector<8x8xi32>
    %250 = arith.cmpi eq, %249, %248 : vector<8x8xi32>
    %251 = arith.extui %250 : vector<8x8xi1> to vector<8x8xi32>
    %252 = arith.sitofp %251 : vector<8x8xi32> to vector<8x8xf32>
    %cst_113 = arith.constant dense<0.000000e+00> : vector<8x16xf32>
    %253 = tpu.matmul %252, %246, %cst_113 {dimension_numbers = #tpu.dot_dimension_numbers<[1], [0], [0], [1], [0, 0, 1, 1], [], []>} : vector<8x8xf32>, vector<8x16xf32>, vector<8x16xf32> -> vector<8x16xf32>
    %cst_114 = arith.constant 0.000000e+00 : f32
    %254 = vector.broadcast %cst_114 : f32 to vector<8x16xf32>
    %255 = arith.cmpf ogt, %253, %254 : vector<8x16xf32>
    %256 = vector.broadcast %71 : vector<1x32xf32> to vector<16x32xf32>
    %257 = arith.mulf %237, %256 : vector<16x32xf32>
    "tpu.trace_start"() <{level = 10 : i32, message = "tc,sc->ts"}> : () -> ()
    %cst_115 = arith.constant dense<0.000000e+00> : vector<8x16xf32>
    %258 = tpu.matmul %87, %257, %cst_115 {dimension_numbers = #tpu.dot_dimension_numbers<[1], [1], [0], [0], [0, 0, 1, 0], [], []>} : vector<8x32xf32>, vector<16x32xf32>, vector<8x16xf32> -> vector<8x16xf32>
    %cst_116 = arith.constant -1.000000e+30 : f32
    "tpu.trace_stop"() : () -> ()
    %259 = vector.broadcast %cst_116 : f32 to vector<8x16xf32>
    %260 = arith.select %255, %258, %259 : vector<8x16xi1>, vector<8x16xf32>
    %cst_117 = arith.constant dense<0xFF800000> : vector<8xf32>
    %261 = vector.multi_reduction <maximumf>, %260, %cst_117 [1] : vector<8x16xf32> to vector<8xf32>
    %262 = vector.shape_cast %261 : vector<8xf32> to vector<8x1xf32>
    %263 = vector.broadcast %262 : vector<8x1xf32> to vector<8x16xf32>
    %264 = arith.subf %260, %263 : vector<8x16xf32>
    %265 = math.exp %264 : vector<8x16xf32>
    %266 = arith.mulf %265, %253 : vector<8x16xf32>
    %cst_118 = arith.constant dense<0.000000e+00> : vector<8xf32>
    %267 = vector.multi_reduction <add>, %266, %cst_118 [1] : vector<8x16xf32> to vector<8xf32>
    %268 = vector.shape_cast %267 : vector<8xf32> to vector<8x1xf32>
    %cst_119 = arith.constant 0.000000e+00 : f32
    %269 = vector.broadcast %cst_119 : f32 to vector<8x1xf32>
    %270 = arith.cmpf ogt, %268, %269 : vector<8x1xf32>
    %cst_120 = arith.constant 1.000000e+00 : f32
    %271 = vector.broadcast %cst_120 : f32 to vector<8x1xf32>
    %272 = arith.select %270, %268, %271 : vector<8x1xi1>, vector<8x1xf32>
    %273 = vector.broadcast %272 : vector<8x1xf32> to vector<8x16xf32>
    %274 = arith.divf %266, %273 : vector<8x16xf32>
    %275 = vector.broadcast %71 : vector<1x32xf32> to vector<16x32xf32>
    %276 = arith.mulf %240, %275 : vector<16x32xf32>
    %cst_121 = arith.constant dense<0.000000e+00> : vector<8x32xf32>
    %277 = tpu.matmul %274, %276, %cst_121 {dimension_numbers = #tpu.dot_dimension_numbers<[1], [0], [0], [1], [0, 0, 1, 1], [], []>} : vector<8x16xf32>, vector<16x32xf32>, vector<8x32xf32> -> vector<8x32xf32>
    %278 = arith.addf %99, %277 : vector<8x32xf32>
    %279 = vector.broadcast %78 : vector<1x32xf32> to vector<16x32xf32>
    %280 = arith.mulf %237, %279 : vector<16x32xf32>
    "tpu.trace_start"() <{level = 10 : i32, message = "tc,sc->ts"}> : () -> ()
    %cst_122 = arith.constant dense<0.000000e+00> : vector<8x16xf32>
    %281 = tpu.matmul %87, %280, %cst_122 {dimension_numbers = #tpu.dot_dimension_numbers<[1], [1], [0], [0], [0, 0, 1, 0], [], []>} : vector<8x32xf32>, vector<16x32xf32>, vector<8x16xf32> -> vector<8x16xf32>
    %cst_123 = arith.constant -1.000000e+30 : f32
    "tpu.trace_stop"() : () -> ()
    %282 = vector.broadcast %cst_123 : f32 to vector<8x16xf32>
    %283 = arith.select %255, %281, %282 : vector<8x16xi1>, vector<8x16xf32>
    %cst_124 = arith.constant dense<0xFF800000> : vector<8xf32>
    %284 = vector.multi_reduction <maximumf>, %283, %cst_124 [1] : vector<8x16xf32> to vector<8xf32>
    %285 = vector.shape_cast %284 : vector<8xf32> to vector<8x1xf32>
    %286 = vector.broadcast %285 : vector<8x1xf32> to vector<8x16xf32>
    %287 = arith.subf %283, %286 : vector<8x16xf32>
    %288 = math.exp %287 : vector<8x16xf32>
    %289 = arith.mulf %288, %253 : vector<8x16xf32>
    %cst_125 = arith.constant dense<0.000000e+00> : vector<8xf32>
    %290 = vector.multi_reduction <add>, %289, %cst_125 [1] : vector<8x16xf32> to vector<8xf32>
    %291 = vector.shape_cast %290 : vector<8xf32> to vector<8x1xf32>
    %cst_126 = arith.constant 0.000000e+00 : f32
    %292 = vector.broadcast %cst_126 : f32 to vector<8x1xf32>
    %293 = arith.cmpf ogt, %291, %292 : vector<8x1xf32>
    %cst_127 = arith.constant 1.000000e+00 : f32
    %294 = vector.broadcast %cst_127 : f32 to vector<8x1xf32>
    %295 = arith.select %293, %291, %294 : vector<8x1xi1>, vector<8x1xf32>
    %296 = vector.broadcast %295 : vector<8x1xf32> to vector<8x16xf32>
    %297 = arith.divf %289, %296 : vector<8x16xf32>
    %298 = vector.broadcast %78 : vector<1x32xf32> to vector<16x32xf32>
    %299 = arith.mulf %240, %298 : vector<16x32xf32>
    %cst_128 = arith.constant dense<0.000000e+00> : vector<8x32xf32>
    %300 = tpu.matmul %297, %299, %cst_128 {dimension_numbers = #tpu.dot_dimension_numbers<[1], [0], [0], [1], [0, 0, 1, 1], [], []>} : vector<8x16xf32>, vector<16x32xf32>, vector<8x32xf32> -> vector<8x32xf32>
    %301 = arith.addf %278, %300 : vector<8x32xf32>
    %c3 = arith.constant 3 : index
    %c0_129 = arith.constant 0 : index
    %c0_130 = arith.constant 0 : index
    %302 = vector.load %arg19[%c3, %c0_129, %c0_130] : memref<4x32x32xf32, #tpu.memory_space<vmem>>, vector<1x32x32xf32>
    %303 = vector.shape_cast %302 : vector<1x32x32xf32> to vector<32x32xf32>
    %cst_131 = arith.constant dense<0.000000e+00> : vector<16x32xf32>
    %304 = tpu.matmul %96, %303, %cst_131 {dimension_numbers = #tpu.dot_dimension_numbers<[1], [0], [0], [1], [0, 0, 1, 1], [], []>} : vector<16x32xf32>, vector<32x32xf32>, vector<16x32xf32> -> vector<16x32xf32>
    %c3_132 = arith.constant 3 : index
    %c0_133 = arith.constant 0 : index
    %c0_134 = arith.constant 0 : index
    %305 = vector.load %arg20[%c3_132, %c0_133, %c0_134] : memref<4x32x32xf32, #tpu.memory_space<vmem>>, vector<1x32x32xf32>
    %306 = vector.shape_cast %305 : vector<1x32x32xf32> to vector<32x32xf32>
    %cst_135 = arith.constant dense<0.000000e+00> : vector<16x32xf32>
    %307 = tpu.matmul %98, %306, %cst_135 {dimension_numbers = #tpu.dot_dimension_numbers<[1], [0], [0], [1], [0, 0, 1, 1], [], []>} : vector<16x32xf32>, vector<32x32xf32>, vector<16x32xf32> -> vector<16x32xf32>
    %c24 = arith.constant 24 : index
    %c0_136 = arith.constant 0 : index
    %308 = vector.load %arg21[%c24, %c0_136] : memref<32x1xi32, #tpu.memory_space<vmem>>, vector<8x1xi32>
    %309 = tpu.iota {dimensions = array<i32: 1>} : vector<8x16xi32>
    %310 = vector.broadcast %308 : vector<8x1xi32> to vector<8x16xi32>
    %311 = arith.cmpi eq, %310, %309 : vector<8x16xi32>
    %312 = arith.extui %311 : vector<8x16xi1> to vector<8x16xi32>
    %313 = arith.sitofp %312 : vector<8x16xi32> to vector<8x16xf32>
    %c0_137 = arith.constant 0 : index
    %c24_138 = arith.constant 24 : index
    %314 = vector.load %arg22[%c0_137, %c24_138] : memref<1x32xi32, #tpu.memory_space<vmem>>, vector<1x8xi32>
    %315 = tpu.iota {dimensions = array<i32: 0>} : vector<8x8xi32>
    %316 = vector.broadcast %314 : vector<1x8xi32> to vector<8x8xi32>
    %317 = arith.cmpi eq, %316, %315 : vector<8x8xi32>
    %318 = arith.extui %317 : vector<8x8xi1> to vector<8x8xi32>
    %319 = arith.sitofp %318 : vector<8x8xi32> to vector<8x8xf32>
    %cst_139 = arith.constant dense<0.000000e+00> : vector<8x16xf32>
    %320 = tpu.matmul %319, %313, %cst_139 {dimension_numbers = #tpu.dot_dimension_numbers<[1], [0], [0], [1], [0, 0, 1, 1], [], []>} : vector<8x8xf32>, vector<8x16xf32>, vector<8x16xf32> -> vector<8x16xf32>
    %cst_140 = arith.constant 0.000000e+00 : f32
    %321 = vector.broadcast %cst_140 : f32 to vector<8x16xf32>
    %322 = arith.cmpf ogt, %320, %321 : vector<8x16xf32>
    %323 = vector.broadcast %71 : vector<1x32xf32> to vector<16x32xf32>
    %324 = arith.mulf %304, %323 : vector<16x32xf32>
    "tpu.trace_start"() <{level = 10 : i32, message = "tc,sc->ts"}> : () -> ()
    %cst_141 = arith.constant dense<0.000000e+00> : vector<8x16xf32>
    %325 = tpu.matmul %87, %324, %cst_141 {dimension_numbers = #tpu.dot_dimension_numbers<[1], [1], [0], [0], [0, 0, 1, 0], [], []>} : vector<8x32xf32>, vector<16x32xf32>, vector<8x16xf32> -> vector<8x16xf32>
    %cst_142 = arith.constant -1.000000e+30 : f32
    "tpu.trace_stop"() : () -> ()
    %326 = vector.broadcast %cst_142 : f32 to vector<8x16xf32>
    %327 = arith.select %322, %325, %326 : vector<8x16xi1>, vector<8x16xf32>
    %cst_143 = arith.constant dense<0xFF800000> : vector<8xf32>
    %328 = vector.multi_reduction <maximumf>, %327, %cst_143 [1] : vector<8x16xf32> to vector<8xf32>
    %329 = vector.shape_cast %328 : vector<8xf32> to vector<8x1xf32>
    %330 = vector.broadcast %329 : vector<8x1xf32> to vector<8x16xf32>
    %331 = arith.subf %327, %330 : vector<8x16xf32>
    %332 = math.exp %331 : vector<8x16xf32>
    %333 = arith.mulf %332, %320 : vector<8x16xf32>
    %cst_144 = arith.constant dense<0.000000e+00> : vector<8xf32>
    %334 = vector.multi_reduction <add>, %333, %cst_144 [1] : vector<8x16xf32> to vector<8xf32>
    %335 = vector.shape_cast %334 : vector<8xf32> to vector<8x1xf32>
    %cst_145 = arith.constant 0.000000e+00 : f32
    %336 = vector.broadcast %cst_145 : f32 to vector<8x1xf32>
    %337 = arith.cmpf ogt, %335, %336 : vector<8x1xf32>
    %cst_146 = arith.constant 1.000000e+00 : f32
    %338 = vector.broadcast %cst_146 : f32 to vector<8x1xf32>
    %339 = arith.select %337, %335, %338 : vector<8x1xi1>, vector<8x1xf32>
    %340 = vector.broadcast %339 : vector<8x1xf32> to vector<8x16xf32>
    %341 = arith.divf %333, %340 : vector<8x16xf32>
    %342 = vector.broadcast %71 : vector<1x32xf32> to vector<16x32xf32>
    %343 = arith.mulf %307, %342 : vector<16x32xf32>
    %cst_147 = arith.constant dense<0.000000e+00> : vector<8x32xf32>
    %344 = tpu.matmul %341, %343, %cst_147 {dimension_numbers = #tpu.dot_dimension_numbers<[1], [0], [0], [1], [0, 0, 1, 1], [], []>} : vector<8x16xf32>, vector<16x32xf32>, vector<8x32xf32> -> vector<8x32xf32>
    %345 = arith.addf %301, %344 : vector<8x32xf32>
    %346 = vector.broadcast %78 : vector<1x32xf32> to vector<16x32xf32>
    %347 = arith.mulf %304, %346 : vector<16x32xf32>
    "tpu.trace_start"() <{level = 10 : i32, message = "tc,sc->ts"}> : () -> ()
    %cst_148 = arith.constant dense<0.000000e+00> : vector<8x16xf32>
    %348 = tpu.matmul %87, %347, %cst_148 {dimension_numbers = #tpu.dot_dimension_numbers<[1], [1], [0], [0], [0, 0, 1, 0], [], []>} : vector<8x32xf32>, vector<16x32xf32>, vector<8x16xf32> -> vector<8x16xf32>
    %cst_149 = arith.constant -1.000000e+30 : f32
    "tpu.trace_stop"() : () -> ()
    %349 = vector.broadcast %cst_149 : f32 to vector<8x16xf32>
    %350 = arith.select %322, %348, %349 : vector<8x16xi1>, vector<8x16xf32>
    %cst_150 = arith.constant dense<0xFF800000> : vector<8xf32>
    %351 = vector.multi_reduction <maximumf>, %350, %cst_150 [1] : vector<8x16xf32> to vector<8xf32>
    %352 = vector.shape_cast %351 : vector<8xf32> to vector<8x1xf32>
    %353 = vector.broadcast %352 : vector<8x1xf32> to vector<8x16xf32>
    %354 = arith.subf %350, %353 : vector<8x16xf32>
    %355 = math.exp %354 : vector<8x16xf32>
    %356 = arith.mulf %355, %320 : vector<8x16xf32>
    %cst_151 = arith.constant dense<0.000000e+00> : vector<8xf32>
    %357 = vector.multi_reduction <add>, %356, %cst_151 [1] : vector<8x16xf32> to vector<8xf32>
    %358 = vector.shape_cast %357 : vector<8xf32> to vector<8x1xf32>
    %cst_152 = arith.constant 0.000000e+00 : f32
    %359 = vector.broadcast %cst_152 : f32 to vector<8x1xf32>
    %360 = arith.cmpf ogt, %358, %359 : vector<8x1xf32>
    %cst_153 = arith.constant 1.000000e+00 : f32
    %361 = vector.broadcast %cst_153 : f32 to vector<8x1xf32>
    %362 = arith.select %360, %358, %361 : vector<8x1xi1>, vector<8x1xf32>
    %363 = vector.broadcast %362 : vector<8x1xf32> to vector<8x16xf32>
    %364 = arith.divf %356, %363 : vector<8x16xf32>
    %365 = vector.broadcast %78 : vector<1x32xf32> to vector<16x32xf32>
    %366 = arith.mulf %307, %365 : vector<16x32xf32>
    %cst_154 = arith.constant dense<0.000000e+00> : vector<8x32xf32>
    %367 = tpu.matmul %364, %366, %cst_154 {dimension_numbers = #tpu.dot_dimension_numbers<[1], [0], [0], [1], [0, 0, 1, 1], [], []>} : vector<8x16xf32>, vector<16x32xf32>, vector<8x32xf32> -> vector<8x32xf32>
    %368 = arith.addf %345, %367 : vector<8x32xf32>
    %cst_155 = arith.constant 5.000000e-01 : f32
    %369 = vector.broadcast %cst_155 : f32 to vector<8x32xf32>
    %370 = arith.mulf %369, %368 : vector<8x32xf32>
    %cst_156 = arith.constant 0.707106769 : f32
    %371 = vector.broadcast %cst_156 : f32 to vector<8x32xf32>
    %372 = arith.mulf %368, %371 : vector<8x32xf32>
    %373 = math.erf %372 : vector<8x32xf32>
    %cst_157 = arith.constant 1.000000e+00 : f32
    %374 = vector.broadcast %cst_157 : f32 to vector<8x32xf32>
    %375 = arith.addf %374, %373 : vector<8x32xf32>
    %376 = arith.mulf %370, %375 : vector<8x32xf32>
    %c0_158 = arith.constant 0 : index
    %c0_159 = arith.constant 0 : index
    %c0_160 = arith.constant 0 : index
    %377 = vector.load %arg15[%c0_158, %c0_159, %c0_160] : memref<1x32x32xf32, #tpu.memory_space<vmem>>, vector<1x32x32xf32>
    %378 = vector.shape_cast %377 : vector<1x32x32xf32> to vector<32x32xf32>
    %cst_161 = arith.constant dense<0.000000e+00> : vector<8x32xf32>
    %379 = tpu.matmul %376, %378, %cst_161 {dimension_numbers = #tpu.dot_dimension_numbers<[1], [0], [0], [1], [0, 0, 1, 1], [], []>} : vector<8x32xf32>, vector<32x32xf32>, vector<8x32xf32> -> vector<8x32xf32>
    %c0_162 = arith.constant 0 : index
    %c0_163 = arith.constant 0 : index
    %c0_164 = arith.constant 0 : index
    %380 = vector.load %arg16[%c0_162, %c0_163, %c0_164] : memref<1x1x32xf32, #tpu.memory_space<vmem>>, vector<1x1x32xf32>
    %381 = vector.shape_cast %380 : vector<1x1x32xf32> to vector<1x32xf32>
    %382 = vector.broadcast %381 : vector<1x32xf32> to vector<8x32xf32>
    %383 = arith.addf %379, %382 : vector<8x32xf32>
    %c0_165 = arith.constant 0 : index
    %384 = memref.load %arg0[%c0_165] : memref<2xf32, #tpu.memory_space<smem>>
    %385 = vector.broadcast %384 : f32 to vector<8x32xf32>
    %386 = arith.mulf %385, %383 : vector<8x32xf32>
    %cst_166 = arith.constant 1.000000e+00 : f32
    %387 = arith.subf %cst_166, %384 : f32
    %388 = vector.broadcast %387 : f32 to vector<8x32xf32>
    %389 = arith.mulf %388, %31 : vector<8x32xf32>
    %390 = arith.addf %386, %389 : vector<8x32xf32>
    %cst_167 = arith.constant 5.000000e-01 : f32
    %391 = vector.broadcast %cst_167 : f32 to vector<16x32xf32>
    %392 = arith.mulf %391, %234 : vector<16x32xf32>
    %cst_168 = arith.constant 0.707106769 : f32
    %393 = vector.broadcast %cst_168 : f32 to vector<16x32xf32>
    %394 = arith.mulf %234, %393 : vector<16x32xf32>
    %395 = math.erf %394 : vector<16x32xf32>
    %cst_169 = arith.constant 1.000000e+00 : f32
    %396 = vector.broadcast %cst_169 : f32 to vector<16x32xf32>
    %397 = arith.addf %396, %395 : vector<16x32xf32>
    %398 = arith.mulf %392, %397 : vector<16x32xf32>
    %c0_170 = arith.constant 0 : index
    %c0_171 = arith.constant 0 : index
    %c0_172 = arith.constant 0 : index
    %399 = vector.load %arg17[%c0_170, %c0_171, %c0_172] : memref<1x32x32xf32, #tpu.memory_space<vmem>>, vector<1x32x32xf32>
    %400 = vector.shape_cast %399 : vector<1x32x32xf32> to vector<32x32xf32>
    %cst_173 = arith.constant dense<0.000000e+00> : vector<16x32xf32>
    %401 = tpu.matmul %398, %400, %cst_173 {dimension_numbers = #tpu.dot_dimension_numbers<[1], [0], [0], [1], [0, 0, 1, 1], [], []>} : vector<16x32xf32>, vector<32x32xf32>, vector<16x32xf32> -> vector<16x32xf32>
    %c0_174 = arith.constant 0 : index
    %c0_175 = arith.constant 0 : index
    %c0_176 = arith.constant 0 : index
    %402 = vector.load %arg18[%c0_174, %c0_175, %c0_176] : memref<1x1x32xf32, #tpu.memory_space<vmem>>, vector<1x1x32xf32>
    %403 = vector.shape_cast %402 : vector<1x1x32xf32> to vector<1x32xf32>
    %404 = vector.broadcast %403 : vector<1x32xf32> to vector<16x32xf32>
    %405 = arith.addf %401, %404 : vector<16x32xf32>
    %c1_177 = arith.constant 1 : index
    %406 = memref.load %arg0[%c1_177] : memref<2xf32, #tpu.memory_space<smem>>
    %407 = vector.broadcast %406 : f32 to vector<16x32xf32>
    %408 = arith.mulf %407, %405 : vector<16x32xf32>
    %cst_178 = arith.constant 1.000000e+00 : f32
    %409 = arith.subf %cst_178, %406 : f32
    %410 = vector.broadcast %409 : f32 to vector<16x32xf32>
    %411 = arith.mulf %410, %63 : vector<16x32xf32>
    %412 = arith.addf %408, %411 : vector<16x32xf32>
    %c0_179 = arith.constant 0 : index
    %c0_180 = arith.constant 0 : index
    %413 = vector.load %arg25[%c0_179, %c0_180] : memref<8x32xf32, #tpu.memory_space<vmem>>, vector<8x32xf32>
    tpu.vector_store %arg25[%c0_179, %c0_180], %390 {strides = array<i32>} : memref<8x32xf32, #tpu.memory_space<vmem>>, vector<8x32xf32>,
    %c0_181 = arith.constant 0 : index
    %c0_182 = arith.constant 0 : index
    %414 = vector.load %arg26[%c0_181, %c0_182] : memref<16x32xf32, #tpu.memory_space<vmem>>, vector<16x32xf32>
    tpu.vector_store %arg26[%c0_181, %c0_182], %412 {strides = array<i32>} : memref<16x32xf32, #tpu.memory_space<vmem>>, vector<16x32xf32>,
    %c0_183 = arith.constant 0 : index
    %c0_184 = arith.constant 0 : index
    %415 = vector.load %arg23[%c0_183, %c0_184] : memref<16x1xi32, #tpu.memory_space<vmem>>, vector<16x1xi32>
    %416 = tpu.iota {dimensions = array<i32: 1>} : vector<16x8xi32>
    %417 = vector.broadcast %415 : vector<16x1xi32> to vector<16x8xi32>
    %418 = arith.cmpi eq, %417, %416 : vector<16x8xi32>
    %419 = arith.extui %418 : vector<16x8xi1> to vector<16x8xi32>
    %420 = arith.sitofp %419 : vector<16x8xi32> to vector<16x8xf32>
    %c0_185 = arith.constant 0 : index
    %c0_186 = arith.constant 0 : index
    %421 = vector.load %arg24[%c0_185, %c0_186] : memref<16x1xi32, #tpu.memory_space<vmem>>, vector<16x1xi32>
    %422 = tpu.iota {dimensions = array<i32: 1>} : vector<16x16xi32>
    %423 = vector.broadcast %421 : vector<16x1xi32> to vector<16x16xi32>
    %424 = arith.cmpi eq, %423, %422 : vector<16x16xi32>
    %425 = arith.extui %424 : vector<16x16xi1> to vector<16x16xi32>
    %426 = arith.sitofp %425 : vector<16x16xi32> to vector<16x16xf32>
    %cst_187 = arith.constant dense<0.000000e+00> : vector<16x32xf32>
    %427 = tpu.matmul %420, %390, %cst_187 {dimension_numbers = #tpu.dot_dimension_numbers<[1], [0], [0], [1], [0, 0, 1, 1], [], []>} : vector<16x8xf32>, vector<8x32xf32>, vector<16x32xf32> -> vector<16x32xf32>
    %cst_188 = arith.constant dense<0.000000e+00> : vector<16x32xf32>
    %428 = tpu.matmul %426, %412, %cst_188 {dimension_numbers = #tpu.dot_dimension_numbers<[1], [0], [0], [1], [0, 0, 1, 1], [], []>} : vector<16x16xf32>, vector<16x32xf32>, vector<16x32xf32> -> vector<16x32xf32>
    %429 = arith.mulf %427, %428 : vector<16x32xf32>
    %cst_189 = arith.constant dense<0.000000e+00> : vector<16xf32>
    %430 = vector.multi_reduction <add>, %429, %cst_189 [1] : vector<16x32xf32> to vector<16xf32>
    %431 = vector.shape_cast %430 : vector<16xf32> to vector<16x1xf32>
    %c0_190 = arith.constant 0 : index
    %c0_191 = arith.constant 0 : index
    %432 = vector.load %arg27[%c0_190, %c0_191] : memref<16x1xf32, #tpu.memory_space<vmem>>, vector<16x1xf32>
    tpu.vector_store %arg27[%c0_190, %c0_191], %431 {strides = array<i32>} : memref<16x1xf32, #tpu.memory_space<vmem>>, vector<16x1xf32>,
    return
  }
}

</mosaic_0001>

<bundles_post_ra>
// kernel: tpu_custom_call.1
= control target key start
LH: loop header
LB: loop body
LE: loop exit
PB: predicated region body
PF: predicated region fallthrough
CT: control target
= control target key end

     0   :  { %s5737_s0 = inlined_call_operand.vmem [shape: f32[2], index: 0, kind: input, shape index: {}]   ;;  %s5738_s1 = inlined_call_operand.hbm [shape: f32[8,24], index: 1, kind: input, shape index: {}]   ;;  %s5739_s2 = inlined_call_operand.vmem [shape: f32[16,40], index: 2, kind: input, shape index: {}]   ;;  %s5740_s3 = inlined_call_operand.hbm [shape: f32[24,32], index: 3, kind: input, shape index: {}]   ;;  %s5741_s4 = inlined_call_operand.vmem [shape: f32[1,32], index: 4, kind: input, shape index: {}]   ;;  %s5742_s5 = inlined_call_operand.vmem [shape: f32[40,32], index: 5, kind: input, shape index: {}]   ;;  %s5743_s6 = inlined_call_operand.hbm [shape: f32[1,32], index: 6, kind: input, shape index: {}]   ;;  %s5744_s7 = inlined_call_operand.hbm [shape: f32[1,32], index: 7, kind: input, shape index: {}]   ;;  %s5745_s8 = inlined_call_operand.hbm [shape: f32[1,32], index: 8, kind: input, shape index: {}]   ;;  %s5746_s9 = inlined_call_operand.hbm [shape: f32[1,32], index: 9, kind: input, shape index: {}]   ;;  %s5747_s10 = inlined_call_operand.hbm [shape: f32[1,32], index: 10, kind: input, shape index: {}]   ;;  %s5748_s11 = inlined_call_operand.vmem [shape: f32[1,32,96], index: 11, kind: input, shape index: {}]   ;;  %s5749_s12 = inlined_call_operand.hbm [shape: f32[1,1,96], index: 12, kind: input, shape index: {}]   ;;  %s5750_s13 = inlined_call_operand.vmem [shape: f32[1,32,96], index: 13, kind: input, shape index: {}]   ;;  %s5751_s14 = inlined_call_operand.hbm [shape: f32[1,1,96], index: 14, kind: input, shape index: {}]   ;;  %s5752_s15 = inlined_call_operand.hbm [shape: f32[1,32,32], index: 15, kind: input, shape index: {}]   ;;  %s5753_s16 = inlined_call_operand.hbm [shape: f32[1,1,32], index: 16, kind: input, shape index: {}]   ;;  %s5754_s17 = inlined_call_operand.hbm [shape: f32[1,32,32], index: 17, kind: input, shape index: {}]   ;;  %s5755_s18 = inlined_call_operand.hbm [shape: f32[1,1,32], index: 18, kind: input, shape index: {}]   ;;  %s5756_s19 = inlined_call_operand.vmem [shape: f32[4,32,32], index: 19, kind: input, shape index: {}]   ;;  %s5757_s20 = inlined_call_operand.hbm [shape: f32[4,32,32], index: 20, kind: input, shape index: {}]   ;;  %s5758_s21 = inlined_call_operand.vmem [shape: s32[32,1], index: 21, kind: input, shape index: {}]   ;;  %s5759_s22 = inlined_call_operand.vmem [shape: s32[1,32], index: 22, kind: input, shape index: {}]   ;;  %s5760_s23 = inlined_call_operand.vmem [shape: s32[16,1], index: 23, kind: input, shape index: {}]   ;;  %s5761_s24 = inlined_call_operand.vmem [shape: s32[16,1], index: 24, kind: input, shape index: {}]   ;;  %s5762_s25 = inlined_call_operand.hbm [shape: f32[8,32], index: 25, kind: output, shape index: {0}]   ;;  %s5763_s26 = inlined_call_operand.hbm [shape: f32[16,32], index: 26, kind: output, shape index: {1}]   ;;  %s5764_s27 = inlined_call_operand.vmem [shape: f32[16,1], index: 27, kind: output, shape index: {2}]  }
   0x1   :  { %5778 = sst [smem:[#allocation41_spill]] %s5737_s0 }
   0x2   :  { %5779 = sst [smem:[#allocation42_spill]] %s5738_s1 }
   0x3   :  { %5780 = sst [smem:[#allocation43_spill]] %s5739_s2 }
   0x4   :  { %5781 = sst [smem:[#allocation44_spill]] %s5740_s3 }
   0x5   :  { %5782 = sst [smem:[#allocation45_spill]] %s5741_s4 }
   0x6   :  { %5783 = sst [smem:[#allocation46_spill]] %s5742_s5 }
   0x7   :  { %5784 = sst [smem:[#allocation47_spill]] %s5743_s6 }
   0x8   :  { %5785 = sst [smem:[#allocation48_spill]] %s5744_s7 }
   0x9   :  { %5786 = sst [smem:[#allocation49_spill]] %s5745_s8 }
   0xa   :  { %5787 = sst [smem:[#allocation50_spill]] %s5746_s9 }
   0xb   :  { %5788 = sst [smem:[#allocation51_spill]] %s5747_s10 }
   0xc   :  { %5789 = sst [smem:[#allocation52_spill]] %s5748_s11 }
   0xd   :  { %5790 = sst [smem:[#allocation53_spill]] %s5762_s25 }
   0xe   :  { %5791 = sst [smem:[#allocation54_spill]] %s5763_s26 }
   0xf   :  { %5792 = sst [smem:[#allocation55_spill]] %s5764_s27 }
  0x10   :  { %33 = vsyncpa [#allocation5], 0 }
  0x11   :  { %34 = vsyncpa [#allocation3], 0 }
  0x12   :  { %35 = vsyncpa [#allocation8], 0 }
  0x13   :  { %36 = vsyncpa [#allocation11], 0 }
  0x14   :  { %37 = vsyncpa [#allocation14], 0 }
  0x15   :  { %38 = vsyncpa [#allocation17], 0 }
  0x16   :  { %39 = vsyncpa [#allocation20], 0 }
  0x17   :  { %40 = vsyncpa [#allocation23], 0 }
  0x18   :  { %41 = vsyncpa [#allocation26], 0 }
  0x19   :  { %42 = vsyncpa [#allocation4], 0 }
  0x1a   :  { %43 = vsyncpa [#allocation29], 0  ;;  %s4824_s7 = smov [#allocation7]   ;;  %s5793_s9 = sld [smem:[#allocation44_spill]] }
  0x1b   :  { %s71_s4 = sshll.u32 %s4824_s7, 4  ;;  %s72_s4 = int_to_ptr.vmem [resolvable:$true] %s71_s4 }
  0x20   :  { %s4438_s5 = scalar_lea.hbm %s5793_s9, 384 }
  0x21   :  { %p4439_p0 = scmp.ne.s32.totalorder %s5793_s9, %s4438_s5  ;;  %p4442_p1 = scmp.lt.u32.totalorder %s4438_s5, %s5793_s9 }
  0x23   :  { %p4444_p2 = pnand %p4442_p1, %p4439_p0 }
  0x25   :  { %4447 = shalt.err (!%p4444_p2)
}
  0x26   :  { %s4448_s1 = scalar_lea.vmem %s72_s4, 384  ;;  %p4453_p4 = scmp.lt.s32.totalorder %s72_s4, %s72_s4 }
  0x27   :  { %p4449_p3 = scmp.ne.s32.totalorder %s72_s4, %s4448_s1  ;;  %p4454_p5 = scmp.lt.s32.totalorder %s4448_s1, %s4448_s1 }
  0x29   :  { %p4455_p6 = por %p4454_p5, %p4453_p4 }
  0x2b   :  { %p4456_p7 = pnand %p4455_p6, %p4449_p3 }
  0x2d   :  { %4459 = shalt.err (!%p4456_p7)
}
  0x2e   :  { %s4825_s6 = smov 128   ;;  %s4826_s11 = smov 8  }
  0x2f   :  { %77 = dma.hbm_to_vmem [thread:$0]  %s5793_s9, 384, %s72_s4, [#allocation8], %s4825_s6, %s4825_s6, %s4826_s11  }
  0x30   :  { %s4827_s7 = smov [#allocation10]   ;;  %s4828_s30 = smov [#allocation13]  }
  0x31   :  { %s98_s8 = sshll.u32 %s4827_s7, 4  ;;  %s118_s5 = sshll.u32 %s4828_s30, 4  ;;  %s99_s8 = int_to_ptr.vmem [resolvable:$true] %s98_s8  ;;  %s119_s5 = int_to_ptr.vmem [resolvable:$true] %s118_s5 }
  0x32   :  { %s5794_s10 = sld [smem:[#allocation48_spill]] }
  0x38   :  { %s4460_s29 = scalar_lea.hbm %s5794_s10, 16 }
  0x39   :  { %p4461_p8 = scmp.ne.s32.totalorder %s5794_s10, %s4460_s29  ;;  %p4464_p9 = scmp.lt.u32.totalorder %s4460_s29, %s5794_s10 }
  0x3b   :  { %p4466_p10 = pnand %p4464_p9, %p4461_p8 }
  0x3d   :  { %4469 = shalt.err (!%p4466_p10)
}
  0x3e   :  { %s4470_s4 = scalar_lea.vmem %s99_s8, 16  ;;  %s4474_s9 = scalar_lea.vmem %s99_s8, 32 }
  0x3f   :  { %p4471_p11 = scmp.ne.s32.totalorder %s99_s8, %s4470_s4  ;;  %p4475_p12 = scmp.lt.s32.totalorder %s99_s8, %s99_s8 }
  0x40   :  { %p4476_p13 = scmp.lt.s32.totalorder %s4474_s9, %s4470_s4 }
  0x42   :  { %p4477_p0 = por %p4476_p13, %p4475_p12 }
  0x44   :  { %p4478_p1 = pnand %p4477_p0, %p4471_p11 }
  0x46   :  { %4481 = shalt.err (!%p4478_p1)
}
  0x47   :  { %101 = dma.hbm_to_vmem [thread:$0]  %s5794_s10, 16, %s99_s8, [#allocation11]  }
  0x48   :  { %s5795_s30 = sld [smem:[#allocation50_spill]] }
  0x4e   :  { %s4482_s25 = scalar_lea.hbm %s5795_s30, 16 }
  0x4f   :  { %p4483_p2 = scmp.ne.s32.totalorder %s5795_s30, %s4482_s25  ;;  %p4486_p3 = scmp.lt.u32.totalorder %s4482_s25, %s5795_s30 }
  0x51   :  { %p4488_p4 = pnand %p4486_p3, %p4483_p2 }
  0x53   :  { %4491 = shalt.err (!%p4488_p4)
}
  0x54   :  { %s4492_s1 = scalar_lea.vmem %s119_s5, 16  ;;  %s4496_s4 = scalar_lea.vmem %s119_s5, 32 }
  0x55   :  { %p4493_p5 = scmp.ne.s32.totalorder %s119_s5, %s4492_s1  ;;  %p4497_p6 = scmp.lt.s32.totalorder %s119_s5, %s119_s5 }
  0x56   :  { %p4498_p7 = scmp.lt.s32.totalorder %s4496_s4, %s4492_s1 }
  0x58   :  { %p4499_p8 = por %p4498_p7, %p4497_p6 }
  0x5a   :  { %p4500_p9 = pnand %p4499_p8, %p4493_p5 }
  0x5c   :  { %4503 = shalt.err (!%p4500_p9)
}
  0x5d   :  { %121 = dma.hbm_to_vmem [thread:$0]  %s5795_s30, 16, %s119_s5, [#allocation14]  }
  0x5e   :  { %s4829_s9 = smov [#allocation16]   ;;  %s4830_s3 = smov [#allocation19]  }
  0x5f   :  { %s140_s2 = sshll.u32 %s4829_s9, 4  ;;  %s161_s27 = sshll.u32 %s4830_s3, 4  ;;  %s141_s2 = int_to_ptr.vmem [resolvable:$true] %s140_s2  ;;  %s162_s27 = int_to_ptr.vmem [resolvable:$true] %s161_s27 }
  0x60   :  { %s4504_s26 = scalar_lea.hbm %s5749_s12, 16 }
  0x61   :  { %p4505_p10 = scmp.ne.s32.totalorder %s5749_s12, %s4504_s26  ;;  %p4508_p11 = scmp.lt.u32.totalorder %s4504_s26, %s5749_s12 }
  0x63   :  { %p4510_p12 = pnand %p4508_p11, %p4505_p10 }
  0x65   :  { %4513 = shalt.err (!%p4510_p12)
}
  0x66   :  { %s4514_s5 = scalar_lea.vmem %s141_s2, 16  ;;  %s4518_s30 = scalar_lea.vmem %s141_s2, 32 }
  0x67   :  { %p4515_p13 = scmp.ne.s32.totalorder %s141_s2, %s4514_s5  ;;  %p4519_p0 = scmp.lt.s32.totalorder %s141_s2, %s141_s2 }
  0x68   :  { %p4520_p1 = scmp.lt.s32.totalorder %s4518_s30, %s4514_s5 }
  0x6a   :  { %p4521_p2 = por %p4520_p1, %p4519_p0 }
  0x6c   :  { %p4522_p3 = pnand %p4521_p2, %p4515_p13 }
  0x6e   :  { %4525 = shalt.err (!%p4522_p3)
}
  0x6f   :  { %143 = dma.hbm_to_vmem [thread:$0]  %s5749_s12, 16, %s141_s2, [#allocation17]  }
  0x70   :  { %s4526_s3 = scalar_lea.hbm %s5752_s15, 512 }
  0x71   :  { %p4527_p4 = scmp.ne.s32.totalorder %s5752_s15, %s4526_s3  ;;  %p4530_p5 = scmp.lt.u32.totalorder %s4526_s3, %s5752_s15 }
  0x73   :  { %p4532_p6 = pnand %p4530_p5, %p4527_p4 }
  0x75   :  { %4535 = shalt.err (!%p4532_p6)
}
  0x76   :  { %s4536_s0 = scalar_lea.vmem %s162_s27, 512  ;;  %p4541_p8 = scmp.lt.s32.totalorder %s162_s27, %s162_s27 }
  0x77   :  { %p4537_p7 = scmp.ne.s32.totalorder %s162_s27, %s4536_s0  ;;  %p4542_p9 = scmp.lt.s32.totalorder %s4536_s0, %s4536_s0 }
  0x79   :  { %p4543_p10 = por %p4542_p9, %p4541_p8 }
  0x7b   :  { %p4544_p11 = pnand %p4543_p10, %p4537_p7 }
  0x7d   :  { %4547 = shalt.err (!%p4544_p11)
}
  0x7e   :  { %167 = dma.hbm_to_vmem [thread:$0]  %s5752_s15, 512, %s162_s27, [#allocation20], %s4825_s6, %s4825_s6, %s4826_s11  }
  0x7f   :  { %s4831_s29 = smov [#allocation22]   ;;  %s5796_s4 = sld [smem:[#allocation41_spill]] }
  0x80   :  { %s183_s1 = sshll.u32 %s4831_s29, 4  ;;  %s4548_s3 = scalar_lea.hbm %s5754_s17, 512  ;;  %s184_s1 = int_to_ptr.vmem [resolvable:$true] %s183_s1 }
  0x81   :  { %p4549_p12 = scmp.ne.s32.totalorder %s5754_s17, %s4548_s3  ;;  %p4552_p13 = scmp.lt.u32.totalorder %s4548_s3, %s5754_s17 }
  0x83   :  { %p4554_p0 = pnand %p4552_p13, %p4549_p12 }
  0x85   :  { %s50_s8 = sshll.u32 %s5796_s4, 4  ;;  %s51_s8 = int_to_ptr.vmem [resolvable:$true] %s50_s8 }
  0x86   :  { %4557 = shalt.err (!%p4554_p0)
}
  0x87   :  { %s4558_s15 = scalar_lea.vmem %s184_s1, 512  ;;  %p4563_p2 = scmp.lt.s32.totalorder %s184_s1, %s184_s1 }
  0x88   :  { %p4559_p1 = scmp.ne.s32.totalorder %s184_s1, %s4558_s15  ;;  %p4564_p3 = scmp.lt.s32.totalorder %s4558_s15, %s4558_s15 }
  0x8a   :  { %p4565_p4 = por %p4564_p3, %p4563_p2 }
  0x8c   :  { %p4566_p5 = pnand %p4565_p4, %p4559_p1 }
  0x8e   :  { %4569 = shalt.err (!%p4566_p5)
}
  0x8f   :  { %189 = dma.hbm_to_vmem [thread:$0]  %s5754_s17, 512, %s184_s1, [#allocation23], %s4825_s6, %s4825_s6, %s4826_s11  }
  0x90   :  { %s4570_s12 = scalar_lea.vmem %s51_s8, 16  ;;  %p4575_p7 = scmp.lt.s32.totalorder %s51_s8, %s51_s8 }
  0x91   :  { %p4571_p6 = scmp.ne.s32.totalorder %s51_s8, %s4570_s12  ;;  %p4576_p8 = scmp.lt.s32.totalorder %s4570_s12, %s4570_s12 }
  0x93   :  { %p4577_p9 = por %p4576_p8, %p4575_p7 }
  0x95   :  { %p4578_p10 = pnand %p4577_p9, %p4571_p6 }
  0x97   :  { %4581 = shalt.err (!%p4578_p10)
}
  0x98   :  { %s4832_s2 = smov [#allocation2]   ;;  %s4833_s29 = smov [#allocation6]  }
  0x99   :  { %53 = dma.vmem_to_smem %s51_s8, 16, %s4832_s2, [#allocation5]  }
  0x9a   :  { %s60_s5 = sshll.u32 %s4833_s29, 4  ;;  %s4834_s30 = smov [#allocation9]   ;;  %s61_s5 = int_to_ptr.vmem [resolvable:$true] %s60_s5 }
  0x9b   :  { %s88_s4 = sshll.u32 %s4834_s30, 4  ;;  %s5797_s3 = sld [smem:[#allocation42_spill]]  ;;  %s89_s4 = int_to_ptr.vmem [resolvable:$true] %s88_s4 }
  0xa1   :  { %s4582_s7 = scalar_lea.hbm %s5797_s3, 128 }
  0xa2   :  { %p4583_p11 = scmp.ne.s32.totalorder %s5797_s3, %s4582_s7  ;;  %p4586_p12 = scmp.lt.u32.totalorder %s4582_s7, %s5797_s3 }
  0xa4   :  { %p4588_p13 = pnand %p4586_p12, %p4583_p11 }
  0xa6   :  { %4591 = shalt.err (!%p4588_p13)
}
  0xa7   :  { %s4592_s8 = scalar_lea.vmem %s61_s5, 128  ;;  %p4597_p1 = scmp.lt.s32.totalorder %s61_s5, %s61_s5 }
  0xa8   :  { %p4593_p0 = scmp.ne.s32.totalorder %s61_s5, %s4592_s8  ;;  %p4598_p2 = scmp.lt.s32.totalorder %s4592_s8, %s4592_s8 }
  0xaa   :  { %p4599_p3 = por %p4598_p2, %p4597_p1 }
  0xac   :  { %p4600_p4 = pnand %p4599_p3, %p4593_p0 }
  0xae   :  { %4603 = shalt.err (!%p4600_p4)
}
  0xaf   :  { %63 = dma.hbm_to_vmem [thread:$0]  %s5797_s3, 128, %s61_s5, [#allocation3]  }
  0xb0   :  { %s5798_s12 = sld [smem:[#allocation47_spill]] }
  0xb6   :  { %s4604_s2 = scalar_lea.hbm %s5798_s12, 16 }
  0xb7   :  { %p4605_p5 = scmp.ne.s32.totalorder %s5798_s12, %s4604_s2  ;;  %p4608_p6 = scmp.lt.u32.totalorder %s4604_s2, %s5798_s12 }
  0xb9   :  { %p4610_p7 = pnand %p4608_p6, %p4605_p5 }
  0xbb   :  { %4613 = shalt.err (!%p4610_p7)
}
  0xbc   :  { %s4614_s7 = scalar_lea.vmem %s89_s4, 16  ;;  %s4618_s25 = scalar_lea.vmem %s89_s4, 32 }
  0xbd   :  { %p4615_p8 = scmp.ne.s32.totalorder %s89_s4, %s4614_s7  ;;  %p4619_p9 = scmp.lt.s32.totalorder %s89_s4, %s89_s4 }
  0xbe   :  { %p4620_p10 = scmp.lt.s32.totalorder %s4618_s25, %s4614_s7 }
  0xc0   :  { %p4621_p11 = por %p4620_p10, %p4619_p9 }
  0xc2   :  { %p4622_p12 = pnand %p4621_p11, %p4615_p8 }
  0xc4   :  { %4625 = shalt.err (!%p4622_p12)
}
  0xc5   :  { %91 = dma.hbm_to_vmem [thread:$0]  %s5798_s12, 16, %s89_s4, [#allocation8]  }
  0xc6   :  { %s4835_s17 = smov [#allocation12]   ;;  %s4836_s26 = smov [#allocation15]  }
  0xc7   :  { %s108_s1 = sshll.u32 %s4835_s17, 4  ;;  %s128_s8 = sshll.u32 %s4836_s26, 4  ;;  %s109_s1 = int_to_ptr.vmem [resolvable:$true] %s108_s1  ;;  %s129_s8 = int_to_ptr.vmem [resolvable:$true] %s128_s8 }
  0xc8   :  { %s5799_s27 = sld [smem:[#allocation49_spill]] }
  0xce   :  { %s4626_s0 = scalar_lea.hbm %s5799_s27, 16 }
  0xcf   :  { %p4627_p13 = scmp.ne.s32.totalorder %s5799_s27, %s4626_s0  ;;  %p4630_p0 = scmp.lt.u32.totalorder %s4626_s0, %s5799_s27 }
  0xd1   :  { %p4632_p1 = pnand %p4630_p0, %p4627_p13 }
  0xd3   :  { %4635 = shalt.err (!%p4632_p1)
}
  0xd4   :  { %s4636_s4 = scalar_lea.vmem %s109_s1, 16  ;;  %s4640_s12 = scalar_lea.vmem %s109_s1, 32 }
  0xd5   :  { %p4637_p2 = scmp.ne.s32.totalorder %s109_s1, %s4636_s4  ;;  %p4641_p3 = scmp.lt.s32.totalorder %s109_s1, %s109_s1 }
  0xd6   :  { %p4642_p4 = scmp.lt.s32.totalorder %s4640_s12, %s4636_s4 }
  0xd8   :  { %p4643_p5 = por %p4642_p4, %p4641_p3 }
  0xda   :  { %p4644_p6 = pnand %p4643_p5, %p4637_p2 }
  0xdc   :  { %4647 = shalt.err (!%p4644_p6)
}
  0xdd   :  { %111 = dma.hbm_to_vmem [thread:$0]  %s5799_s27, 16, %s109_s1, [#allocation11]  }
  0xde   :  { %s5800_s3 = sld [smem:[#allocation51_spill]] }
  0xe4   :  { %s4648_s17 = scalar_lea.hbm %s5800_s3, 16 }
  0xe5   :  { %p4649_p7 = scmp.ne.s32.totalorder %s5800_s3, %s4648_s17  ;;  %p4652_p8 = scmp.lt.u32.totalorder %s4648_s17, %s5800_s3 }
  0xe7   :  { %p4654_p9 = pnand %p4652_p8, %p4649_p7 }
  0xe9   :  { %4657 = shalt.err (!%p4654_p9)
}
  0xea   :  { %s4658_s2 = scalar_lea.vmem %s129_s8, 16  ;;  %s4662_s29 = scalar_lea.vmem %s129_s8, 32 }
  0xeb   :  { %p4659_p10 = scmp.ne.s32.totalorder %s129_s8, %s4658_s2  ;;  %p4663_p11 = scmp.lt.s32.totalorder %s129_s8, %s129_s8 }
  0xec   :  { %p4664_p12 = scmp.lt.s32.totalorder %s4662_s29, %s4658_s2 }
  0xee   :  { %p4665_p13 = por %p4664_p12, %p4663_p11 }
  0xf0   :  { %p4666_p0 = pnand %p4665_p13, %p4659_p10 }
  0xf2   :  { %4669 = shalt.err (!%p4666_p0)
}
  0xf3   :  { %131 = dma.hbm_to_vmem [thread:$0]  %s5800_s3, 16, %s129_s8, [#allocation14]  }
  0xf4   :  { %s4837_s30 = smov [#allocation18]   ;;  %s4838_s4 = smov [#allocation21]  }
  0xf5   :  { %s152_s10 = sshll.u32 %s4837_s30, 4  ;;  %s174_s12 = sshll.u32 %s4838_s4, 4  ;;  %s153_s10 = int_to_ptr.vmem [resolvable:$true] %s152_s10  ;;  %s175_s12 = int_to_ptr.vmem [resolvable:$true] %s174_s12 }
  0xf6   :  { %s4670_s25 = scalar_lea.hbm %s5751_s14, 16 }
  0xf7   :  { %p4671_p1 = scmp.ne.s32.totalorder %s5751_s14, %s4670_s25  ;;  %p4674_p2 = scmp.lt.u32.totalorder %s4670_s25, %s5751_s14 }
  0xf9   :  { %p4676_p3 = pnand %p4674_p2, %p4671_p1 }
  0xfb   :  { %4679 = shalt.err (!%p4676_p3)
}
  0xfc   :  { %s4680_s8 = scalar_lea.vmem %s153_s10, 16  ;;  %s4684_s3 = scalar_lea.vmem %s153_s10, 32 }
  0xfd   :  { %p4681_p4 = scmp.ne.s32.totalorder %s153_s10, %s4680_s8  ;;  %p4685_p5 = scmp.lt.s32.totalorder %s153_s10, %s153_s10 }
  0xfe   :  { %p4686_p6 = scmp.lt.s32.totalorder %s4684_s3, %s4680_s8 }
 0x100   :  { %p4687_p7 = por %p4686_p6, %p4685_p5 }
 0x102   :  { %p4688_p8 = pnand %p4687_p7, %p4681_p4 }
 0x104   :  { %4691 = shalt.err (!%p4688_p8)
}
 0x105   :  { %155 = dma.hbm_to_vmem [thread:$0]  %s5751_s14, 16, %s153_s10, [#allocation17]  }
 0x106   :  { %s4692_s1 = scalar_lea.hbm %s5753_s16, 16 }
 0x107   :  { %p4693_p9 = scmp.ne.s32.totalorder %s5753_s16, %s4692_s1  ;;  %p4696_p10 = scmp.lt.u32.totalorder %s4692_s1, %s5753_s16 }
 0x109   :  { %p4698_p11 = pnand %p4696_p10, %p4693_p9 }
 0x10b   :  { %4701 = shalt.err (!%p4698_p11)
}
 0x10c   :  { %s4702_s7 = scalar_lea.vmem %s175_s12, 16  ;;  %s4706_s25 = scalar_lea.vmem %s175_s12, 32 }
 0x10d   :  { %p4703_p12 = scmp.ne.s32.totalorder %s175_s12, %s4702_s7  ;;  %p4707_p13 = scmp.lt.s32.totalorder %s175_s12, %s175_s12 }
 0x10e   :  { %p4708_p0 = scmp.lt.s32.totalorder %s4706_s25, %s4702_s7 }
 0x110   :  { %p4709_p1 = por %p4708_p0, %p4707_p13 }
 0x112   :  { %p4710_p2 = pnand %p4709_p1, %p4703_p12 }
 0x114   :  { %4713 = shalt.err (!%p4710_p2)
}
 0x115   :  { %177 = dma.hbm_to_vmem [thread:$0]  %s5753_s16, 16, %s175_s12, [#allocation20]  }
 0x116   :  { %s4839_s5 = smov [#allocation24]   ;;  %s4840_s26 = smov [#allocation25]  }
 0x117   :  { %s196_s17 = sshll.u32 %s4839_s5, 4  ;;  %s207_s28 = sshll.u32 %s4840_s26, 4  ;;  %s197_s17 = int_to_ptr.vmem [resolvable:$true] %s196_s17  ;;  %s208_s28 = int_to_ptr.vmem [resolvable:$true] %s207_s28 }
 0x118   :  { %s4714_s15 = scalar_lea.hbm %s5755_s18, 16 }
 0x119   :  { %p4715_p3 = scmp.ne.s32.totalorder %s5755_s18, %s4714_s15  ;;  %p4718_p4 = scmp.lt.u32.totalorder %s4714_s15, %s5755_s18 }
 0x11b   :  { %p4720_p5 = pnand %p4718_p4, %p4715_p3 }
 0x11d   :  { %4723 = shalt.err (!%p4720_p5)
}
 0x11e   :  { %s4724_s16 = scalar_lea.vmem %s197_s17, 16  ;;  %s4728_s12 = scalar_lea.vmem %s197_s17, 32 }
 0x11f   :  { %p4725_p6 = scmp.ne.s32.totalorder %s197_s17, %s4724_s16  ;;  %p4729_p7 = scmp.lt.s32.totalorder %s197_s17, %s197_s17 }
 0x120   :  { %p4730_p8 = scmp.lt.s32.totalorder %s4728_s12, %s4724_s16 }
 0x122   :  { %p4731_p9 = por %p4730_p8, %p4729_p7 }
 0x124   :  { %p4732_p10 = pnand %p4731_p9, %p4725_p6 }
 0x126   :  { %4735 = shalt.err (!%p4732_p10)
}
 0x127   :  { %199 = dma.hbm_to_vmem [thread:$0]  %s5755_s18, 16, %s197_s17, [#allocation23]  }
 0x128   :  { %s4736_s7 = scalar_lea.hbm %s5757_s20, 2048 }
 0x129   :  { %p4737_p11 = scmp.ne.s32.totalorder %s5757_s20, %s4736_s7  ;;  %p4740_p12 = scmp.lt.u32.totalorder %s4736_s7, %s5757_s20 }
 0x12b   :  { %p4742_p13 = pnand %p4740_p12, %p4737_p11 }
 0x12d   :  { %4745 = shalt.err (!%p4742_p13)
}
 0x12e   :  { %s4746_s26 = scalar_lea.vmem %s208_s28, 2048  ;;  %p4751_p1 = scmp.lt.s32.totalorder %s208_s28, %s208_s28 }
 0x12f   :  { %p4747_p0 = scmp.ne.s32.totalorder %s208_s28, %s4746_s26  ;;  %p4752_p2 = scmp.lt.s32.totalorder %s4746_s26, %s4746_s26 }
 0x131   :  { %p4753_p3 = por %p4752_p2, %p4751_p1 }
 0x133   :  { %p4754_p4 = pnand %p4753_p3, %p4747_p0 }
 0x135   :  { %4757 = shalt.err (!%p4754_p4)
}
 0x136   :  { %213 = dma.hbm_to_vmem [thread:$0]  %s5757_s20, 2048, %s208_s28, [#allocation26], %s4825_s6, %s4825_s6, %s4826_s11  }
 0x137   :  { %4802 = dma.done.wait [#allocation5], 16  }
 0x138   :  { %4803 = vsyncadd [#allocation5], 4294967280 }
 0x139   :  { %4804 = dma.done.wait [#allocation3], 128  }
 0x13a   :  { %4805 = vsyncadd [#allocation3], 4294967168 }
 0x13b   :  { %4806 = dma.done.wait [#allocation8], 400  }
 0x13c   :  { %4807 = vsyncadd [#allocation8], 4294966896 }
 0x13d   :  { %4808 = dma.done.wait [#allocation11], 32  }
 0x13e   :  { %4809 = vsyncadd [#allocation11], 4294967264 }
 0x13f   :  { %4810 = dma.done.wait [#allocation14], 32  }
 0x140   :  { %4811 = vsyncadd [#allocation14], 4294967264 }
 0x141   :  { %4812 = dma.done.wait [#allocation17], 32  }
 0x142   :  { %4813 = vsyncadd [#allocation17], 4294967264 }
 0x143   :  { %4814 = dma.done.wait [#allocation20], 528  }
 0x144   :  { %4815 = vsyncadd [#allocation20], 4294966768 }
 0x145   :  { %4816 = dma.done.wait [#allocation23], 528  }
 0x146   :  { %4817 = vsyncadd [#allocation23], 4294966768 }
 0x147   :  { %4818 = dma.done.wait [#allocation26], 2048  }
 0x148   :  { %4819 = vsyncadd [#allocation26], 4294965248 }
 0x149   :  { %267 = sfence }
 0x14a   :  { %v269_v0 = vld [vmem:[#allocation7] sm:$0xff]  ;;  %v270_v1 = vld [vmem:[#allocation7 + $0x8] sm:$0xff]  ;;  %v4841_v2 = vmov 0.0|0.0   ;;  %vm4842_vm0 = vmmov 0   ;;  %v4843_v4 = vmov 0.0   ;;  %s5801_s8 = sld [smem:[#allocation46_spill]] }
 0x14b   :  { %4205 = vmatprep.subr.bf16.mxu0 %v4841_v2  ;;  %v4206_v3 = vpack.c.bf16 %v270_v1, %v269_v0  ;;  %3929 = vmatprep.mubr.msk.f32.mxu0 %vm4842_vm0, %v4843_v4  ;;  %vm409_vm1 = vcmask 326656   ;;  %s5802_s27 = sld [smem:[#allocation43_spill]]  ;;  %v271_v12 = vld [vmem:[#allocation7 + $0x10] sm:$0xff]  ;;  %v268_v13 = vld [vmem:[#allocation6] sm:$0xff]  ;;  %vm281_vm2 = vcmask 195584   ;;  %s5803_s10 = sld [smem:[#allocation52_spill]] }
 0x14c   :  { %v634_v22 = vld [vmem:[%s5750_s13] sm:$0xff]  ;;  %v635_v23 = vld [vmem:[%s5750_s13 + $0x8] sm:$0xff]  ;;  %v636_v24 = vld [vmem:[%s5750_s13 + $0x10] sm:$0xff]  ;;  %v4844_v29 = vmov 0   ;;  %s5804_s9 = sld [smem:[#allocation45_spill]]  ;;  %vm356_vm3 = vcmask 261120  }
 0x14d   :  { %4207 = vmatpush3.bf16.msra.mxu0 %v4206_v3  ;;  %v4222_v25 = vpack.c.bf16 %v635_v23, %v634_v22  ;;  %v637_v26 = vld [vmem:[%s5750_s13 + $0x18] sm:$0xff]  ;;  %v881_v28 = vld [vmem:[%s5758_s21] sm:$0xff]  ;;  %4373 = vset.pattern.permute.xlu0 %v4844_v29  ;;  %vm902_vm6 = vcmask 64512   ;;  %s4845_s28 = smov 64   ;;  %s4847_s3 = smov 96  }
 0x14e   :  { %3927 = vmatprep.subr.mxu0 %v4843_v4  ;;  %v4226_v27 = vpack.c.bf16 %v637_v26, %v636_v24  ;;  %4379 = vset.pattern.permute.xlu1 %v4844_v29  ;;  %v3671_v35 = vld [vmem:[#allocation9] ss:$0 sm:$0xff]  ;;  %v3670_v29 = vld [vmem:[#allocation12] ss:$0 sm:$0xff]  ;;  %s4848_s15 = smov 120   ;;  %s4849_s17 = smov 112  }
 0x14f   :  { %883 = vperm.xlu0 %4373, %v881_v28   ;;  %v727_v28 = vld [vmem:[%s5756_s19 + $0x8] sm:$0xff]  ;;  %s4851_s14 = smov [#allocation27]   ;;  %s4852_s5 = smov [#allocation28]  }
 0x150   :  { %v395_v5 = vld [vmem:[%s5801_s8] sm:$0xff]  ;;  %v396_v6 = vld [vmem:[%s5801_s8 + $0x8] sm:$0xff]  ;;  %v397_v8 = vld [vmem:[%s5801_s8 + $0x10] sm:$0xff]  ;;  %s3639_s26 = sshll.u32 %s4852_s5, 4  ;;  %s5697_s26 = int_to_ptr.vmem [resolvable:$true] %s3639_s26 }
 0x151   :  { %v4208_v7 = vpack.c.bf16 %v396_v6, %v395_v5  ;;  %v398_v9 = vld [vmem:[%s5801_s8 + $0x18] sm:$0xff]  ;;  %v393_v11 = vld [vmem:[%s5802_s27] sm:$0xff]  ;;  %3928 = vmatpush3.msra.mxu0 %v271_v12  ;;  %v394_v15 = vld [vmem:[%s5802_s27 + $0x8] sm:$0xff] }
 0x152   :  { %v4212_v10 = vpack.c.bf16 %v398_v9, %v397_v8  ;;  %3942 = vmatprep.mubr.msk.f32.mxu1 %vm409_vm1, %v393_v11  ;;  %v399_v14 = vld [vmem:[%s5801_s8 + $0x20] sm:$0xff]  ;;  %3930 = vmatmul.mubr.msk.f32.vlgmr.msra.gmra.mrb[0].mxu0 %vm281_vm2, %v268_v13  ;;  %v551_v17 = vld [vmem:[%s5803_s10 + $0x8] sm:$0xff]  ;;  %v552_v19 = vld [vmem:[%s5803_s10 + $0x10] sm:$0xff]  ;;  %s4850_s8 = smov 104  }
 0x153   :  { %4209 = vmatprep.subr.bf16.mxu1 %v4208_v7  ;;  %4216 = vmatprep.subr.bf16.mxu0 %v4841_v2  ;;  %v550_v16 = vld [vmem:[%s5803_s10] sm:$0xff]  ;;  %v553_v20 = vld [vmem:[%s5803_s10 + $0x18] sm:$0xff]  ;;  %s3630_s10 = sshll.u32 %s4851_s14, 4  ;;  %s3631_s10 = int_to_ptr.vmem [resolvable:$true] %s3630_s10 }
 0x154   :  { %4211 = vmatpush3.bf16.msra.mxu1 %v4208_v7  ;;  %3953 = vmatprep.mubr.msk.f32.mxu0 %vm4842_vm0, %v4843_v4  ;;  %v4217_v18 = vpack.c.bf16 %v551_v17, %v550_v16  ;;  %v4220_v21 = vpack.c.bf16 %v553_v20, %v552_v19  ;;  %v3667_v30 = vld [vmem:[%s5804_s9] ss:$0 sm:$0xff]  ;;  %s4758_s18 = scalar_lea.vmem %s3631_s10, 128  ;;  %p4763_p6 = scmp.lt.s32.totalorder %s3631_s10, %s3631_s10 }
 0x155   :  { %4213 = vmatprep.subr.bf16.mxu1 %v4212_v10  ;;  %p4759_p5 = scmp.ne.s32.totalorder %s3631_s10, %s4758_s18  ;;  %p4764_p7 = scmp.lt.s32.totalorder %s4758_s18, %s4758_s18 }
 0x156   :  { %4218 = vmatpush3.bf16.msra.mxu0 %v4217_v18 }
 0x157   :  { %4219 = vmatprep.subr.bf16.mxu0 %v4841_v2  ;;  %p4765_p8 = por %p4764_p7, %p4763_p6 }
 0x158   :  { %4215 = vmatpush3.bf16.msra.mxu1 %v4212_v10 }
 0x159   :  { %3940 = vmatprep.subr.mxu1 %v399_v14  ;;  %p4766_p9 = pnand %p4765_p8, %p4759_p5 }
 0x15a   :  { %4221 = vmatpush3.bf16.msra.mxu0 %v4220_v21 }
 0x15b   :  { %4230 = vmatprep.subr.bf16.mxu0 %v4841_v2 }
 0x15c   :  { %3941 = vmatpush3.msra.mxu1 %v399_v14 }
 0x15d   :  { %3943 = vmatmul.mubr.msk.f32.vlgmr.msra.gmra.mrb[0].mxu1 %vm409_vm1, %v394_v15  ;;  %4223 = vmatprep.subr.bf16.mxu1 %v4222_v25 }
 0x15e   :  { %4225 = vmatpush3.bf16.msra.mxu1 %v4222_v25  ;;  %v3669_v25 = vld [vmem:[#allocation10] ss:$0 sm:$0xff] }
 0x15f   :  { %4227 = vmatprep.subr.bf16.mxu1 %v4226_v27 }
 0x162   :  { %4229 = vmatpush3.bf16.msra.mxu1 %v4226_v27  ;;  %v726_v27 = vld [vmem:[%s5756_s19] sm:$0xff] }
 0x163   :  { %4236 = vmatprep.subr.bf16.mxu1 %v4841_v2 }
 0x225   :  { %v351_v31 = vpop.f32.mrb[0].mxu0 }
 0x226   :  { %v352_v32 = vadd.f32 %v3667_v30, %v351_v31  ;;  %v3931_v33 = vpop.f32.mrb[1].mxu0  ;;  %v4231_v31 = vpack.c.bf16 %v727_v28, %v726_v27 }
 0x228   :  { %v355_v34 = vmax.f32 %v352_v32, 0.0 }
 0x22a   :  { %v357_v36 = vsel %vm356_vm3, %v355_v34, 0.0 }
 0x22b   :  { %v358_v37 = vrot.slane %v357_v36, 4 }
 0x22d   :  { %v359_v41 = vadd.f32 %v358_v37, %v357_v36  ;;  %v3675_v37 = vld [vmem:[#allocation15] ss:$0 sm:$0xff] }
 0x22f   :  { %v360_v44 = vrot.slane %v359_v41, 2 }
 0x230   :  { %v3944_v38 = vpop.f32.mrb[0].mxu1 }
 0x231   :  { %v488_v39 = vadd.f32 %v3944_v38, %v3671_v35  ;;  %v482_v40 = vpop.f32.mrb[1].mxu1  ;;  %v361_v47 = vadd.f32 %v360_v44, %v359_v41 }
 0x232   :  { %v483_v42 = vadd.f32 %v3671_v35, %v482_v40 }
 0x233   :  { %v492_v43 = vmax.f32 %v488_v39, 0.0  ;;  %v362_v50 = vrot.slane %v361_v47, 1 }
 0x234   :  { %v491_v45 = vmax.f32 %v483_v42, 0.0  ;;  %v728_v42 = vld [vmem:[%s5756_s19 + $0x10] sm:$0xff] }
 0x235   :  { %v494_v46 = vsel %vm356_vm3, %v492_v43, 0.0  ;;  %v363_v52 = vadd.f32 %v362_v50, %v361_v47 }
 0x236   :  { %v493_v48 = vsel %vm356_vm3, %v491_v45, 0.0 }
 0x237   :  { %v495_v49 = vadd.f32 %v494_v46, %v493_v48  ;;  %v365_v54 = vmul.f32 0.125, %v363_v52  ;;  %v804_v46 = vld [vmem:[#allocation25 + $0x8] sm:$0xff]  ;;  %v805_v48 = vld [vmem:[#allocation25 + $0x10] sm:$0xff] }
 0x239   :  { %v496_v51 = vrot.slane %v495_v49, 4  ;;  %v366_v56 = vsub.f32 %v355_v34, %v365_v54  ;;  %v3674_v34 = vld [vmem:[#allocation13] ss:$0 sm:$0xff]  ;;  %v3709_v54 = vld [vmem:[%s5759_s22] ss:$0 sm:$0xff] }
 0x23b   :  { %v497_v53 = vadd.f32 %v496_v51, %v495_v49  ;;  %v367_v58 = vmul.f32 %v366_v56, %v366_v56  ;;  %v806_v49 = vld [vmem:[#allocation25 + $0x18] sm:$0xff]  ;;  %v538_v51 = vlaneseq }
 0x23c   :  { %v4240_v50 = vpack.c.bf16 %v806_v49, %v805_v48 }
 0x23d   :  { %v498_v55 = vrot.slane %v497_v53, 2  ;;  %v368_v60 = vsel %vm356_vm3, %v367_v58, 0.0  ;;  %v890_v52 = vshrl.u32 %v538_v51, 7  ;;  %v884_v58 = vpop.permute.xlu0 %883 }
 0x23e   :  { %v369_v61 = vrot.slane %v368_v60, 4 }
 0x23f   :  { %v499_v57 = vadd.f32 %v498_v55, %v497_v53  ;;  %v5275_v53 = vand.u32 127, %v538_v51  ;;  %v3678_v55 = vld [vmem:[#allocation16] ss:$0 sm:$0xff]  ;;  %vm1540_vm4 = vcmp.eq.s32.totalorder %v3709_v54, %v890_v52  ;;  %v3725_v51 = vld [vmem:[%s5756_s19 + $0x40] sm:$0xff] }
 0x240   :  { %v370_v63 = vadd.f32 %v369_v61, %v368_v60  ;;  %v5288_v61 = vsel %vm1540_vm4, 1.0, %v4843_v4 }
 0x241   :  { %v500_v59 = vrot.slane %v499_v57, 1  ;;  %vm885_vm5 = vcmp.eq.s32.totalorder %v884_v58, %v5275_v53  ;;  %vm545_vm8 = vcmp.ge.s32.totalorder %v5275_v53, 16  ;;  %vm546_vm9 = vcmp.lt.s32.totalorder %v5275_v53, 32  ;;  %v3728_v58 = vld [vmem:[%s5756_s19 + $0x58] sm:$0xff] }
 0x242   :  { %v371_v1 = vrot.slane %v370_v63, 2  ;;  %vm541_vm10 = vcmp.lt.s32.totalorder %v5275_v53, 16  ;;  %vm547_vm11 = vmand %vm545_vm8, %vm546_vm9 }
 0x243   :  { %v501_v62 = vadd.f32 %v500_v59, %v499_v57 }
 0x244   :  { %v372_v6 = vadd.f32 %v371_v1, %v370_v63  ;;  %v4846_v63 = vmov 1.0   ;;  %v3680_v1 = vld [vmem:[#allocation18] ss:$0 sm:$0xff] }
 0x245   :  { %v503_v0 = vmul.f32 0.0625, %v501_v62  ;;  %v1528_v62 = vld [vmem:[%s5758_s21 + $0x8] sm:$0xff] }
 0x246   :  { %v373_v9 = vrot.slane %v372_v6, 1 }
 0x247   :  { %v504_v3 = vsub.f32 %v491_v45, %v503_v0  ;;  %v505_v5 = vsub.f32 %v492_v43, %v503_v0  ;;  %v729_v43 = vld [vmem:[%s5756_s19 + $0x18] sm:$0xff] }
 0x248   :  { %v374_v13 = vadd.f32 %v373_v9, %v372_v6  ;;  %v4234_v44 = vpack.c.bf16 %v729_v43, %v728_v42  ;;  %v803_v45 = vld [vmem:[#allocation25] sm:$0xff] }
 0x249   :  { %v506_v7 = vmul.f32 %v504_v3, %v504_v3  ;;  %v507_v8 = vmul.f32 %v505_v5, %v505_v5  ;;  %v4237_v47 = vpack.c.bf16 %v804_v46, %v803_v45 }
 0x24a   :  { %v375_v15 = vmul.f32 0.125, %v374_v13 }
 0x24b   :  { %v508_v10 = vsel %vm356_vm3, %v506_v7, 0.0  ;;  %v509_v11 = vsel %vm356_vm3, %v507_v8, 0.0 }
 0x24c   :  { %v510_v12 = vadd.f32 %v509_v11, %v508_v10  ;;  %v376_v17 = vadd.f32 1e-05, %v375_v15  ;;  %v5322_v11 = vsel %vm541_vm10, 1.0, %v4843_v4 }
 0x24e   :  { %v511_v14 = vrot.slane %v510_v12, 4  ;;  %4380 = vrsqrt.f32 %v376_v17  ;;  %v3702_v17 = vld [vmem:[%s5756_s19 + $0x20] sm:$0xff] }
 0x250   :  { %v512_v16 = vadd.f32 %v511_v14, %v510_v12  ;;  %v5325_v12 = vsel %vm547_vm11, 1.0, %v4843_v4 }
 0x252   :  { %v513_v18 = vrot.slane %v512_v16, 2 }
 0x254   :  { %v514_v19 = vadd.f32 %v513_v18, %v512_v16  ;;  %v3703_v18 = vld [vmem:[%s5756_s19 + $0x28] sm:$0xff] }
 0x256   :  { %v515_v20 = vrot.slane %v514_v19, 1 }
 0x258   :  { %v516_v21 = vadd.f32 %v515_v20, %v514_v19  ;;  %v4381_v24 = vpop.eup %4380  ;;  %v4243_v19 = vpack.c.bf16 %v3703_v18, %v3702_v17 }
 0x259   :  { %v378_v26 = vmul.f32 %v4381_v24, %v366_v56  ;;  %v891_v56 = vadd.s32 8, %v890_v52  ;;  %v3726_v52 = vld [vmem:[%s5756_s19 + $0x48] sm:$0xff] }
 0x25a   :  { %v517_v22 = vmul.f32 0.0625, %v516_v21 }
 0x25b   :  { %v385_v30 = vmul.f32 %v3669_v25, %v378_v26  ;;  %vm1541_vm7 = vcmp.eq.s32.totalorder %v3709_v54, %v891_v56  ;;  %v4254_v56 = vpack.c.bf16 %v3726_v52, %v3725_v51 }
 0x25c   :  { %v518_v23 = vadd.f32 1e-05, %v517_v22  ;;  %v3711_v0 = vsel %vm1541_vm7, 1.0, %v4843_v4  ;;  %v3704_v22 = vld [vmem:[%s5756_s19 + $0x30] sm:$0xff] }
 0x25d   :  { %v5251_v32 = vadd.f32 %v3670_v29, %v385_v30  ;;  %v4374_v8 = vpack.i.bf16 %v3711_v0, %v5288_v61 }
 0x25e   :  { %4382 = vrsqrt.f32 %v518_v23  ;;  %v3705_v23 = vld [vmem:[%s5756_s19 + $0x38] sm:$0xff] }
 0x25f   :  { %3954 = vmatmul.mubr.msk.f32.vlgmr.msra.gmra.mrb[2].mxu0 %vm356_vm3, %v5251_v32  ;;  %v4246_v25 = vpack.c.bf16 %v3705_v23, %v3704_v22 }
 0x260   :  { %4232 = vmatpush3.bf16.msra.mxu0 %v4231_v31  ;;  %3975 = vmatprep.mubr.msk.f32.mxu0 %vm4842_vm0, %v4843_v4 }
 0x261   :  { %4233 = vmatprep.subr.bf16.mxu0 %v4841_v2 }
 0x264   :  { %4235 = vmatpush3.bf16.msra.mxu0 %v4234_v44 }
 0x265   :  { %3989 = vmatprep.subr.msk.mxu0 %vm885_vm5, %v4846_v63 }
 0x268   :  { %v4383_v33 = vpop.eup %4382 }
 0x269   :  { %v520_v35 = vmul.f32 %v4383_v33, %v504_v3  ;;  %v521_v36 = vmul.f32 %v4383_v33, %v505_v5 }
 0x26b   :  { %v528_v38 = vmul.f32 %v3674_v34, %v520_v35  ;;  %v529_v39 = vmul.f32 %v3674_v34, %v521_v36 }
 0x26d   :  { %v5258_v40 = vadd.f32 %v3675_v37, %v528_v38  ;;  %v5260_v41 = vadd.f32 %v3675_v37, %v529_v39 }
 0x26f   :  { %3964 = vmatprep.mubr.msk.f32.mxu1 %vm356_vm3, %v5258_v40 }
 0x270   :  { %3965 = vmatmul.mubr.msk.f32.vlgmr.msra.gmra.mrb[2].mxu1 %vm356_vm3, %v5260_v41 }
 0x271   :  { %3986 = vmatprep.mubr.msk.f32.mxu1 %vm4842_vm0, %v4843_v4  ;;  %4238 = vmatpush3.bf16.msra.mxu1 %v4237_v47 }
 0x272   :  { %4239 = vmatprep.subr.bf16.mxu1 %v4841_v2 }
 0x275   :  { %4241 = vmatpush3.bf16.msra.mxu1 %v4240_v50 }
 0x332   :  { %v630_v57 = vpop.f32.mrb[2].mxu0 }
 0x333   :  { %v5280_v59 = vadd.f32 %v3678_v55, %v630_v57  ;;  %v3955_v60 = vpop.f32.mrb[3].mxu0  ;;  %v3727_v57 = vld [vmem:[%s5756_s19 + $0x50] sm:$0xff] }
 0x334   :  { %v4258_v60 = vpack.c.bf16 %v3728_v58, %v3727_v57 }
 0x335   :  { %807 = vrot.lane.b32.xlu0 %v5280_v59, %s4845_s28  ;;  %3976 = vmatmul.mubr.msk.f32.vlgmr.msra.gmra.mrb[4].mxu0 %vm356_vm3, %v5280_v59 }
 0x336   :  { %3991 = vmatprep.mubr.msk.f32.mxu0 %vm902_vm6, %v5288_v61  ;;  %3990 = vmatpush3.msk.msra.mxu0 %vm885_vm5, %v4846_v63 }
 0x339   :  { %1530 = vperm.xlu0 %4373, %v1528_v62   ;;  %3992 = vmatmul.mubr.msk.f32.vlgmr.msra.gmra.mrb[6].mxu0 %vm902_vm6, %v3711_v0 }
 0x343   :  { %v3966_v3 = vpop.f32.mrb[2].mxu1 }
 0x344   :  { %v717_v5 = vpop.f32.mrb[3].mxu1  ;;  %v5301_v7 = vadd.f32 %v3966_v3, %v3680_v1 }
 0x345   :  { %v5299_v6 = vadd.f32 %v3680_v1, %v717_v5 }
 0x347   :  { %989 = vrot.lane.b32.xlu1 %v5299_v6, %s4847_s3 }
 0x34b   :  { %991 = vrot.lane.b32.xlu1 %v5301_v7, %s4847_s3 }
 0x34f   :  { %4375 = vrot.lane.b32.xlu1 %v4374_v8, %s4848_s15 }
 0x3a7   :  { %v5308_v9 = vpop.permute.xlu0 %807 }
 0x3a8   :  { %3987 = vmatmul.mubr.msk.f32.vlgmr.msra.gmra.mrb[4].mxu1 %vm356_vm3, %v5308_v9 }
 0x3b8   :  { %v1531_v26 = vpop.permute.xlu0 %1530 }
 0x3b9   :  { %v5312_v10 = vpop.permute.xlu1 %989  ;;  %vm1532_vm12 = vcmp.eq.s32.totalorder %v1531_v26, %v5275_v53 }
 0x3ba   :  { %3996 = vmatprep.mubr.msk.f32.mxu0 %vm356_vm3, %v5312_v10  ;;  %4001 = vmatprep.mubr.msk.f32.mxu1 %vm356_vm3, %v5312_v10 }
 0x3bd   :  { %v5341_v21 = vpop.permute.xlu1 %991 }
 0x3c1   :  { %v4376_v27 = vpop.permute.xlu1 %4375 }
 0x3c2   :  { %v4377_v28 = vunpack.i.l.bf16 %v4376_v27  ;;  %v4378_v29 = vunpack.i.h.bf16 %v4376_v27 }
 0x408   :  { %v799_v13 = vpop.f32.mrb[4].mxu0 }
 0x409   :  { %v986_v14 = vmul.f32 %v5322_v11, %v799_v13  ;;  %v1106_v15 = vmul.f32 %v5325_v12, %v799_v13  ;;  %v3977_v16 = vpop.f32.mrb[5].mxu0 }
 0x40b   :  { %3994 = vmatprep.subr.msk.mxu0 %vm356_vm3, %v986_v14  ;;  %3999 = vmatprep.subr.msk.mxu1 %vm356_vm3, %v1106_v15 }
 0x40c   :  { %3995 = vmatpush3.xpose.msk.msra.mxu0 %vm356_vm3, %v986_v14  ;;  %4000 = vmatpush3.xpose.msk.msra.mxu1 %vm356_vm3, %v1106_v15  ;;  %v5339_v20 = vpop.f32.mrb[6].mxu0 }
 0x40d   :  { %4242 = vmatprep.subr.bf16.mxu1 %v4841_v2  ;;  %v5350_v24 = vpop.f32.mrb[7].mxu0  ;;  %vm985_vm13 = vcmp.gt.f32.partialorder %v5339_v20, 0.0 }
 0x40e   :  { %vm984_vm14 = vcmp.gt.f32.partialorder %v5350_v24, 0.0 }
 0x40f   :  { %3997 = vmatmul.mubr.msk.f32.vlgmr.msra.gmra.mrb[8].mxu0 %vm356_vm3, %v5341_v21  ;;  %4002 = vmatmul.mubr.msk.f32.vlgmr.msra.gmra.mrb[6].mxu1 %vm356_vm3, %v5341_v21 }
 0x410   :  { %4244 = vmatpush3.bf16.msra.mxu1 %v4243_v19  ;;  %4022 = vmatprep.mubr.msk.f32.mxu1 %vm4842_vm0, %v4843_v4 }
 0x411   :  { %4245 = vmatprep.subr.bf16.mxu1 %v4841_v2 }
 0x414   :  { %4247 = vmatpush3.bf16.msra.mxu1 %v4246_v25 }
 0x415   :  { %4036 = vmatprep.subr.msk.mxu1 %vm1532_vm12, %v4846_v63 }
 0x417   :  { %4023 = vmatmul.mubr.msk.f32.vlgmr.msra.gmra.mrb[8].mxu1 %vm356_vm3, %v5280_v59 }
 0x418   :  { %4037 = vmatpush3.msk.msra.mxu1 %vm1532_vm12, %v4846_v63  ;;  %4038 = vmatprep.mubr.msk.f32.mxu1 %vm902_vm6, %v4377_v28 }
 0x41b   :  { %4039 = vmatmul.mubr.msk.f32.vlgmr.msra.gmra.mrb[10].mxu1 %vm902_vm6, %v4378_v29 }
 0x41c   :  { %4043 = vmatprep.mubr.msk.f32.mxu1 %vm356_vm3, %v5312_v10 }
 0x47b   :  { %v877_v30 = vpop.f32.mrb[4].mxu1 }
 0x47c   :  { %v1215_v31 = vmul.f32 %v5325_v12, %v877_v30  ;;  %v3988_v33 = vpop.f32.mrb[5].mxu1  ;;  %v5370_v34 = vmul.f32 %v5322_v11, %v877_v30 }
 0x47e   :  { %4004 = vmatprep.subr.mxu0 %v1215_v31 }
 0x47f   :  { %4005 = vmatpush3.msra.mxu0 %v1215_v31 }
 0x480   :  { %4009 = vmatprep.subr.mxu0 %v5370_v34 }
 0x4e2   :  { %v3998_v35 = vpop.f32.mrb[8].mxu0  ;;  %v4003_v36 = vpop.f32.mrb[6].mxu1 }
 0x4e3   :  { %v1076_v37 = vsel %vm985_vm13, %v3998_v35, -1e+30  ;;  %v1186_v38 = vsel %vm985_vm13, %v4003_v36, -1e+30  ;;  %v1066_v39 = vpop.f32.mrb[9].mxu0  ;;  %v1176_v42 = vpop.f32.mrb[7].mxu1  ;;  %vm5516_vm13 = vmpackc.low %vm356_vm3, %vm356_vm3 }
 0x4e4   :  { %v1075_v43 = vsel %vm984_vm14, %v1066_v39, -1e+30  ;;  %v1185_v44 = vsel %vm984_vm14, %v1176_v42, -1e+30  ;;  %v1190_v45 = vsel %vm902_vm6, %v1186_v38, -inf  ;;  %v1080_v55 = vsel %vm902_vm6, %v1076_v37, -inf }
 0x4e5   :  { %1191 = vmax.xlane.f32.xlu1 %v1190_v45  ;;  %v1187_v46 = vsel %vm902_vm6, %v1185_v44, -inf  ;;  %v1077_v47 = vsel %vm902_vm6, %v1075_v43, -inf }
 0x4e6   :  { %1188 = vmax.xlane.f32.xlu0 %v1187_v46 }
 0x4ea   :  { %v1449_v48 = vpop.f32.mrb[8].mxu1  ;;  %1078 = vmax.xlane.f32.xlu0 %v1077_v47 }
 0x4eb   :  { %v1633_v49 = vmul.f32 %v5322_v11, %v1449_v48  ;;  %v4024_v50 = vpop.f32.mrb[9].mxu1  ;;  %v1826_v54 = vmul.f32 %v5325_v12, %v1449_v48 }
 0x4ed   :  { %4041 = vmatprep.subr.msk.mxu1 %vm356_vm3, %v1633_v49 }
 0x4ee   :  { %4042 = vmatpush3.xpose.msk.msra.mxu1 %vm356_vm3, %v1633_v49  ;;  %1081 = vmax.xlane.f32.xlu0 %v1080_v55  ;;  %v5410_v62 = vpop.f32.mrb[10].mxu1 }
 0x4ef   :  { %4051 = vmatprep.subr.msk.mxu1 %vm356_vm3, %v1826_v54  ;;  %v5412_v0 = vpop.f32.mrb[11].mxu1  ;;  %vm1632_vm15 = vcmp.gt.f32.partialorder %v5410_v62, 0.0 }
 0x4f0   :  { %vm1631_vm1 = vcmp.gt.f32.partialorder %v5412_v0, 0.0 }
 0x4f1   :  { %4044 = vmatmul.mubr.msk.f32.vlgmr.msra.gmra.mrb[12].mxu1 %vm356_vm3, %v5341_v21 }
 0x4f2   :  { %4052 = vmatpush3.xpose.msk.msra.mxu1 %vm356_vm3, %v1826_v54  ;;  %4053 = vmatprep.mubr.msk.f32.mxu1 %vm356_vm3, %v5312_v10 }
 0x4f3   :  { %4255 = vmatprep.subr.bf16.mxu1 %v4254_v56 }
 0x4f5   :  { %4054 = vmatmul.mubr.msk.f32.vlgmr.msra.gmra.mrb[14].mxu1 %vm356_vm3, %v5341_v21 }
 0x4f6   :  { %4257 = vmatpush3.bf16.msra.mxu1 %v4254_v56  ;;  %4069 = vmatprep.mubr.msk.f32.mxu1 %vm356_vm3, %v5299_v6 }
 0x4f7   :  { %4259 = vmatprep.subr.bf16.mxu1 %v4258_v60 }
 0x4fa   :  { %4261 = vmatpush3.bf16.msra.mxu1 %v4258_v60 }
 0x4fb   :  { %4083 = vmatprep.subr.mxu1 %v4843_v4 }
 0x4fd   :  { %4070 = vmatmul.mubr.msk.f32.vlgmr.msra.gmra.mrb[16].mxu1 %vm356_vm3, %v5301_v7 }
 0x4fe   :  { %4085 = vmatprep.mubr.msk.f32.mxu1 %vm4842_vm0, %v4843_v4 }
 0x572   :  { %v1192_v1 = vpop.xlane.xlu1 %1191 }
 0x573   :  { %v1194_v3 = vsub.f32 %v1186_v38, %v1192_v1  ;;  %v1189_v5 = vpop.xlane.xlu0 %1188 }
 0x574   :  { %v1193_v8 = vsub.f32 %v1185_v44, %v1189_v5 }
 0x575   :  { %v1197_v10 = vmul.f32 1.442695, %v1194_v3 }
 0x576   :  { %v1195_v13 = vmul.f32 1.442695, %v1193_v8 }
 0x577   :  { %4384 = vpow2.f32 %v1197_v10  ;;  %v1079_v14 = vpop.xlane.xlu0 %1078 }
 0x578   :  { %4386 = vpow2.f32 %v1195_v13  ;;  %v1083_v15 = vsub.f32 %v1075_v43, %v1079_v14 }
 0x57a   :  { %v1085_v16 = vmul.f32 1.442695, %v1083_v15 }
 0x57b   :  { %v1082_v17 = vpop.xlane.xlu0 %1081 }
 0x57c   :  { %4388 = vpow2.f32 %v1085_v16  ;;  %v1084_v18 = vsub.f32 %v1076_v37, %v1082_v17 }
 0x57e   :  { %v1087_v19 = vmul.f32 1.442695, %v1084_v18 }
 0x580   :  { %4390 = vpow2.f32 %v1087_v19  ;;  %v1454_v19 = vld [vmem:[#allocation25 + $0x20] sm:$0xff] }
 0x581   :  { %v4385_v21 = vpop.eup %4384 }
 0x582   :  { %v4387_v22 = vpop.eup %4386  ;;  %v1200_v23 = vmul.f32 %v4385_v21, %v5339_v20  ;;  %v1455_v21 = vld [vmem:[#allocation25 + $0x28] sm:$0xff] }
 0x583   :  { %v1199_v25 = vmul.f32 %v4387_v22, %v5350_v24 }
 0x584   :  { %v1204_v26 = vsel %vm902_vm6, %v1200_v23, 0.0 }
 0x585   :  { %1205 = vadd.xlane.f32.xlu0 %v1204_v26  ;;  %v1201_v27 = vsel %vm902_vm6, %v1199_v25, 0.0 }
 0x586   :  { %v4389_v28 = vpop.eup %4388  ;;  %1202 = vadd.xlane.f32.xlu1 %v1201_v27  ;;  %v4249_v27 = vpack.c.bf16 %v1455_v21, %v1454_v19  ;;  %v3423_v21 = vld [vmem:[%s5760_s23] sm:$0xff] }
 0x587   :  { %v1089_v29 = vmul.f32 %v4389_v28, %v5350_v24  ;;  %v1456_v28 = vld [vmem:[#allocation25 + $0x30] sm:$0xff] }
 0x589   :  { %v1091_v30 = vsel %vm902_vm6, %v1089_v29, 0.0 }
 0x58a   :  { %v4391_v31 = vpop.eup %4390  ;;  %1092 = vadd.xlane.f32.xlu1 %v1091_v30 }
 0x58b   :  { %v1090_v33 = vmul.f32 %v4391_v31, %v5339_v20 }
 0x58d   :  { %v1094_v35 = vsel %vm902_vm6, %v1090_v33, 0.0 }
 0x58e   :  { %1095 = vadd.xlane.f32.xlu0 %v1094_v35 }
 0x5c4   :  { %v4045_v36 = vpop.f32.mrb[12].mxu1 }
 0x5c5   :  { %v5424_v37 = vsel %vm1632_vm15, %v4045_v36, -1e+30  ;;  %v1703_v38 = vpop.f32.mrb[13].mxu1 }
 0x5c6   :  { %v5426_v39 = vsel %vm1631_vm1, %v1703_v38, -1e+30  ;;  %v1717_v24 = vsel %vm902_vm6, %v5424_v37, -inf }
 0x5c7   :  { %1718 = vmax.xlane.f32.xlu0 %v1717_v24  ;;  %v1714_v20 = vsel %vm902_vm6, %v5426_v39, -inf }
 0x5c8   :  { %v4055_v42 = vpop.f32.mrb[14].mxu1  ;;  %1715 = vmax.xlane.f32.xlu1 %v1714_v20 }
 0x5c9   :  { %v5432_v43 = vsel %vm1632_vm15, %v4055_v42, -1e+30  ;;  %v1896_v44 = vpop.f32.mrb[15].mxu1 }
 0x5ca   :  { %v5434_v45 = vsel %vm1631_vm1, %v1896_v44, -1e+30  ;;  %v1910_v46 = vsel %vm902_vm6, %v5432_v43, -inf  ;;  %vm2365_vm1 = vcmask 130048  }
 0x5cb   :  { %1911 = vmax.xlane.f32.xlu0 %v1910_v46  ;;  %v1907_v47 = vsel %vm902_vm6, %v5434_v45, -inf }
 0x5cc   :  { %1908 = vmax.xlane.f32.xlu1 %v1907_v47 }
 0x5d0   :  { %v4071_v48 = vpop.f32.mrb[16].mxu1 }
 0x5d1   :  { %v5441_v49 = vmul.f32 %v4071_v48, %v5322_v11  ;;  %v5444_v50 = vmul.f32 %v4071_v48, %v5325_v12  ;;  %v2094_v51 = vpop.f32.mrb[17].mxu1 }
 0x5d2   :  { %v5447_v52 = vmul.f32 %v5322_v11, %v2094_v51  ;;  %v5450_v54 = vmul.f32 %v5325_v12, %v2094_v51 }
 0x5d4   :  { %v4271_v55 = vpack.c.bf16 %v5441_v49, %v5447_v52  ;;  %v4275_v56 = vpack.c.bf16 %v5444_v50, %v5450_v54  ;;  %v3749_v50 = vld [vmem:[%s5756_s19 + $0x78] sm:$0xff] }
 0x612   :  { %v1206_v57 = vpop.xlane.xlu0 %1205 }
 0x613   :  { %vm1208_vm2 = vcmp.gt.f32.partialorder %v1206_v57, 0.0  ;;  %v1203_v58 = vpop.xlane.xlu1 %1202 }
 0x614   :  { %v1210_v60 = vsel %vm1208_vm2, %v1206_v57, 1.0  ;;  %vm1207_vm4 = vcmp.gt.f32.partialorder %v1203_v58, 0.0 }
 0x615   :  { %4392 = vrcp.f32 %v1210_v60  ;;  %v1209_v1 = vsel %vm1207_vm4, %v1203_v58, 1.0 }
 0x616   :  { %4394 = vrcp.f32 %v1209_v1  ;;  %v2191_v1 = vld [vmem:[%s5758_s21 + $0x10] sm:$0xff] }
 0x617   :  { %v1093_v3 = vpop.xlane.xlu1 %1092 }
 0x618   :  { %vm1097_vm5 = vcmp.gt.f32.partialorder %v1093_v3, 0.0 }
 0x619   :  { %v1099_v5 = vsel %vm1097_vm5, %v1093_v3, 1.0 }
 0x61a   :  { %4396 = vrcp.f32 %v1099_v5 }
 0x61b   :  { %v1096_v8 = vpop.xlane.xlu0 %1095 }
 0x61c   :  { %vm1098_vm7 = vcmp.gt.f32.partialorder %v1096_v8, 0.0 }
 0x61d   :  { %v1100_v10 = vsel %vm1098_vm7, %v1096_v8, 1.0 }
 0x61e   :  { %4398 = vrcp.f32 %v1100_v10 }
 0x61f   :  { %v4393_v13 = vpop.eup %4392 }
 0x620   :  { %v4395_v14 = vpop.eup %4394  ;;  %v1214_v16 = vmul.f32 %v4393_v13, %v1200_v23 }
 0x621   :  { %v1212_v15 = vmul.f32 %v4395_v14, %v1199_v25  ;;  %v1457_v25 = vld [vmem:[#allocation25 + $0x38] sm:$0xff] }
 0x622   :  { %v4252_v23 = vpack.c.bf16 %v1457_v25, %v1456_v28  ;;  %v2104_v25 = vld [vmem:[#allocation25 + $0x40] sm:$0xff] }
 0x623   :  { %4006 = vmatprep.mubr.msk.f32.mxu0 %vm902_vm6, %v1212_v15 }
 0x624   :  { %v4397_v17 = vpop.eup %4396  ;;  %4007 = vmatmul.mubr.msk.f32.vlgmr.msra.gmra.mrb[10].mxu0 %vm902_vm6, %v1214_v16  ;;  %v3747_v16 = vld [vmem:[%s5756_s19 + $0x68] sm:$0xff] }
 0x625   :  { %4010 = vmatpush3.msra.mxu0 %v5370_v34  ;;  %v1102_v18 = vmul.f32 %v4397_v17, %v1089_v29 }
 0x626   :  { %4248 = vmatprep.subr.bf16.mxu0 %v4841_v2 }
 0x627   :  { %4011 = vmatprep.mubr.msk.f32.mxu0 %vm902_vm6, %v1102_v18 }
 0x628   :  { %v4399_v22 = vpop.eup %4398 }
 0x629   :  { %v1104_v26 = vmul.f32 %v4399_v22, %v1090_v33 }
 0x62c   :  { %4012 = vmatmul.mubr.msk.f32.vlgmr.msra.gmra.mrb[10].mxu0 %vm902_vm6, %v1104_v26 }
 0x62d   :  { %4250 = vmatpush3.bf16.msra.mxu0 %v4249_v27  ;;  %4033 = vmatprep.mubr.msk.f32.mxu0 %vm4842_vm0, %v4843_v4 }
 0x62e   :  { %4251 = vmatprep.subr.bf16.mxu0 %v4841_v2 }
 0x631   :  { %4253 = vmatpush3.bf16.msra.mxu0 %v4252_v23  ;;  %v2105_v23 = vld [vmem:[#allocation25 + $0x48] sm:$0xff] }
 0x634   :  { %4034 = vmatmul.mubr.msk.f32.vlgmr.msra.gmra.mrb[12].mxu0 %vm356_vm3, %v5308_v9 }
 0x654   :  { %v1719_v34 = vpop.xlane.xlu0 %1718 }
 0x655   :  { %v1721_v29 = vsub.f32 %v5424_v37, %v1719_v34  ;;  %v1716_v30 = vpop.xlane.xlu1 %1715 }
 0x656   :  { %v1720_v31 = vsub.f32 %v5426_v39, %v1716_v30 }
 0x657   :  { %v1724_v33 = vmul.f32 1.442695, %v1721_v29 }
 0x658   :  { %v1722_v35 = vmul.f32 1.442695, %v1720_v31  ;;  %v1912_v36 = vpop.xlane.xlu0 %1911  ;;  %v3748_v31 = vld [vmem:[%s5756_s19 + $0x70] sm:$0xff] }
 0x659   :  { %4400 = vpow2.f32 %v1724_v33  ;;  %v1914_v38 = vsub.f32 %v5432_v43, %v1912_v36  ;;  %v1909_v24 = vpop.xlane.xlu1 %1908  ;;  %v4262_v33 = vpack.c.bf16 %v2105_v23, %v2104_v25  ;;  %v4288_v36 = vpack.c.bf16 %v3749_v50, %v3748_v31 }
 0x65a   :  { %4402 = vpow2.f32 %v1722_v35  ;;  %v1913_v20 = vsub.f32 %v5434_v45, %v1909_v24 }
 0x65b   :  { %v1917_v42 = vmul.f32 1.442695, %v1914_v38 }
 0x65c   :  { %v1915_v44 = vmul.f32 1.442695, %v1913_v20  ;;  %v2106_v20 = vld [vmem:[#allocation25 + $0x50] sm:$0xff] }
 0x65d   :  { %4404 = vpow2.f32 %v1917_v42  ;;  %v2107_v42 = vld [vmem:[#allocation25 + $0x58] sm:$0xff] }
 0x65e   :  { %4406 = vpow2.f32 %v1915_v44 }
 0x663   :  { %v4401_v9 = vpop.eup %4400 }
 0x664   :  { %v4403_v46 = vpop.eup %4402  ;;  %v5472_v37 = vmul.f32 %v4401_v9, %v5410_v62  ;;  %v4266_v9 = vpack.c.bf16 %v2107_v42, %v2106_v20 }
 0x665   :  { %v1726_v39 = vmul.f32 %v4403_v46, %v5412_v0 }
 0x666   :  { %v1731_v47 = vsel %vm902_vm6, %v5472_v37, 0.0 }
 0x667   :  { %v4405_v48 = vpop.eup %4404  ;;  %1732 = vadd.xlane.f32.xlu0 %v1731_v47  ;;  %v1728_v43 = vsel %vm902_vm6, %v1726_v39, 0.0 }
 0x668   :  { %v4407_v51 = vpop.eup %4406  ;;  %1729 = vadd.xlane.f32.xlu1 %v1728_v43  ;;  %v5479_v45 = vmul.f32 %v4405_v48, %v5410_v62  ;;  %v2783_v62 = vld [vmem:[%s5758_s21 + $0x18] sm:$0xff] }
 0x669   :  { %v5482_v57 = vmul.f32 %v4407_v51, %v5412_v0 }
 0x66a   :  { %v1924_v58 = vsel %vm902_vm6, %v5479_v45, 0.0 }
 0x66b   :  { %1925 = vadd.xlane.f32.xlu0 %v1924_v58  ;;  %v1921_v60 = vsel %vm902_vm6, %v5482_v57, 0.0 }
 0x66c   :  { %1922 = vadd.xlane.f32.xlu1 %v1921_v60 }
 0x67d   :  { %2193 = vperm.xlu1 %4379, %v2191_v1  }
 0x681   :  { %2108 = vrot.lane.b32.xlu1 %v5299_v6, %s4845_s28  ;;  %2207 = vrot.lane.b32.xlu0 %v5288_v61, %s4849_s17 }
 0x685   :  { %2284 = vrot.lane.b32.xlu1 %v5280_v59, %s4847_s3  ;;  %2110 = vrot.lane.b32.xlu0 %v5301_v7, %s4845_s28 }
 0x689   :  { %2785 = vperm.xlu1 %4379, %v2783_v62   ;;  %2799 = vrot.lane.b32.xlu0 %v5288_v61, %s4850_s8  ;;  %v3746_v61 = vld [vmem:[%s5756_s19 + $0x60] sm:$0xff] }
 0x68a   :  { %v4284_v22 = vpack.c.bf16 %v3747_v16, %v3746_v61 }
 0x6f4   :  { %v1733_v0 = vpop.xlane.xlu0 %1732 }
 0x6f5   :  { %v1730_v3 = vpop.xlane.xlu1 %1729  ;;  %vm1735_vm9 = vcmp.gt.f32.partialorder %v1733_v0, 0.0 }
 0x6f6   :  { %vm1734_vm8 = vcmp.gt.f32.partialorder %v1730_v3, 0.0  ;;  %v1737_v59 = vsel %vm1735_vm9, %v1733_v0, 1.0 }
 0x6f7   :  { %v1736_v5 = vsel %vm1734_vm8, %v1730_v3, 1.0 }
 0x6f8   :  { %4408 = vrcp.f32 %v1736_v5  ;;  %v1926_v8 = vpop.xlane.xlu0 %1925 }
 0x6f9   :  { %v1923_v10 = vpop.xlane.xlu1 %1922  ;;  %4410 = vrcp.f32 %v1737_v59  ;;  %vm1928_vm12 = vcmp.gt.f32.partialorder %v1926_v8, 0.0 }
 0x6fa   :  { %vm1927_vm10 = vcmp.gt.f32.partialorder %v1923_v10, 0.0  ;;  %v1930_v18 = vsel %vm1928_vm12, %v1926_v8, 1.0 }
 0x6fb   :  { %v1929_v13 = vsel %vm1927_vm10, %v1923_v10, 1.0 }
 0x6fc   :  { %4412 = vrcp.f32 %v1929_v13  ;;  %v2208_v15 = vpop.permute.xlu0 %2207 }
 0x6fd   :  { %v2194_v14 = vpop.permute.xlu1 %2193  ;;  %4414 = vrcp.f32 %v1930_v18 }
 0x6fe   :  { %vm2195_vm11 = vcmp.eq.s32.totalorder %v2194_v14, %v5275_v53 }
 0x6ff   :  { %4084 = vmatpush3.msk.msra.mxu1 %vm2195_vm11, %v4846_v63 }
 0x700   :  { %4274 = vmatprep.subr.bf16.mxu1 %v4841_v2  ;;  %4086 = vmatmul.mubr.msk.f32.vlgmr.msra.gmra.mrb[18].mxu1 %vm902_vm6, %v2208_v15 }
 0x701   :  { %4099 = vmatprep.mubr.msk.f32.mxu1 %vm4842_vm0, %v4843_v4  ;;  %v5526_v27 = vpop.permute.xlu1 %2108 }
 0x702   :  { %v4409_v17 = vpop.eup %4408 }
 0x703   :  { %v1739_v19 = vmul.f32 %v4409_v17, %v1726_v39  ;;  %v4411_v26 = vpop.eup %4410 }
 0x705   :  { %4048 = vmatprep.mubr.msk.f32.mxu0 %vm902_vm6, %v1739_v19  ;;  %v5539_v38 = vpop.permute.xlu1 %2284 }
 0x706   :  { %4277 = vmatpush3.bf16.xpose.msk.msra.mxu1 %vm5516_vm13, %v4275_v56  ;;  %v4413_v34 = vpop.eup %4412  ;;  %v1741_v56 = vmul.f32 %v4411_v26, %v5472_v37 }
 0x707   :  { %v1524_v28 = vpop.f32.mrb[12].mxu0  ;;  %4285 = vmatprep.subr.bf16.mxu1 %v4284_v22  ;;  %v1932_v35 = vmul.f32 %v4413_v34, %v5482_v57  ;;  %v4415_v24 = vpop.eup %4414 }
 0x708   :  { %v1742_v29 = vmul.f32 %v5322_v11, %v1524_v28  ;;  %v4035_v30 = vpop.f32.mrb[13].mxu0  ;;  %v1935_v54 = vmul.f32 %v5325_v12, %v1524_v28  ;;  %v1934_v44 = vmul.f32 %v4415_v24, %v5479_v45 }
 0x709   :  { %v2786_v46 = vpop.permute.xlu1 %2785 }
 0x70a   :  { %4046 = vmatprep.subr.mxu0 %v1742_v29  ;;  %vm2787_vm14 = vcmp.eq.s32.totalorder %v2786_v46, %v5275_v53 }
 0x70b   :  { %4047 = vmatpush3.msra.mxu0 %v1742_v29 }
 0x70c   :  { %4049 = vmatmul.mubr.msk.f32.vlgmr.msra.gmra.mrb[10].mxu0 %vm902_vm6, %v1741_v56  ;;  %4056 = vmatprep.subr.mxu0 %v1935_v54 }
 0x70d   :  { %4057 = vmatpush3.msra.mxu0 %v1935_v54  ;;  %4058 = vmatprep.mubr.msk.f32.mxu0 %vm902_vm6, %v1932_v35 }
 0x70e   :  { %4100 = vmatmul.mubr.msk.f32.vlgmr.msra.gmra.mrb[20].mxu1 %vm356_vm3, %v5539_v38  ;;  %4263 = vmatprep.subr.bf16.mxu0 %v4262_v33 }
 0x70f   :  { %4287 = vmatpush3.bf16.msra.mxu1 %v4284_v22  ;;  %4124 = vmatprep.mubr.msk.f32.mxu1 %vm356_vm3, %v5299_v6  ;;  %v5559_v6 = vpop.permute.xlu0 %2110 }
 0x710   :  { %4289 = vmatprep.subr.bf16.mxu1 %v4288_v36 }
 0x713   :  { %4291 = vmatpush3.bf16.msra.mxu1 %v4288_v36 }
 0x714   :  { %4059 = vmatmul.mubr.msk.f32.vlgmr.msra.gmra.mrb[10].mxu0 %vm902_vm6, %v1934_v44  ;;  %4138 = vmatprep.subr.mxu1 %v4843_v4  ;;  %v2704_v44 = vld [vmem:[#allocation25 + $0x60] sm:$0xff] }
 0x715   :  { %4265 = vmatpush3.bf16.msra.mxu0 %v4262_v33  ;;  %4080 = vmatprep.mubr.msk.f32.mxu0 %vm356_vm3, %v5526_v27 }
 0x716   :  { %4125 = vmatmul.mubr.msk.f32.vlgmr.msra.gmra.mrb[22].mxu1 %vm356_vm3, %v5301_v7  ;;  %4267 = vmatprep.subr.bf16.mxu0 %v4266_v9 }
 0x717   :  { %4139 = vmatpush3.msk.msra.mxu1 %vm2787_vm14, %v4846_v63  ;;  %4140 = vmatprep.mubr.msk.f32.mxu1 %vm4842_vm0, %v4843_v4  ;;  %v2800_v63 = vpop.permute.xlu0 %2799 }
 0x718   :  { %4300 = vmatprep.subr.bf16.mxu1 %v4841_v2 }
 0x719   :  { %4269 = vmatpush3.bf16.msra.mxu0 %v4266_v9  ;;  %v2705_v9 = vld [vmem:[#allocation25 + $0x68] sm:$0xff] }
 0x71a   :  { %4270 = vmatprep.subr.bf16.mxu0 %v4841_v2  ;;  %4141 = vmatmul.mubr.msk.f32.vlgmr.msra.gmra.mrb[24].mxu1 %vm902_vm6, %v2800_v63 }
 0x71b   :  { %4147 = vmatprep.mubr.msk.f32.mxu1 %vm4842_vm0, %v4843_v4 }
 0x71c   :  { %4081 = vmatmul.mubr.msk.f32.vlgmr.msra.gmra.mrb[14].mxu0 %vm356_vm3, %v5559_v6 }
 0x71d   :  { %4092 = vmatprep.mubr.msk.f32.mxu0 %vm4842_vm0, %v4843_v4 }
 0x722   :  { %4273 = vmatpush3.bf16.xpose.msk.msra.mxu0 %vm5516_vm13, %v4271_v55 }
 0x723   :  { %4278 = vmatprep.subr.bf16.mxu0 %v4841_v2 }
 0x729   :  { %4093 = vmatmul.mubr.msk.f32.vlgmr.msra.gmra.mrb[16].mxu0 %vm356_vm3, %v5539_v38 }
 0x72a   :  { %4106 = vmatprep.mubr.msk.f32.mxu0 %vm4842_vm0, %v4843_v4 }
 0x7d3   :  { %v2277_v7 = vpop.f32.mrb[18].mxu1 }
 0x7d4   :  { %v4087_v37 = vpop.f32.mrb[19].mxu1  ;;  %vm2281_vm15 = vcmp.gt.f32.partialorder %v2277_v7, 0.0 }
 0x7e1   :  { %v2456_v49 = vpop.f32.mrb[20].mxu1 }
 0x7e2   :  { %v2460_v52 = vsel %vm2281_vm15, %v2456_v49, -1e+30  ;;  %v4101_v55 = vpop.f32.mrb[21].mxu1 }
 0x7e3   :  { %v2461_v39 = vsel %vm2365_vm1, %v2460_v52, -inf  ;;  %v2707_v55 = vld [vmem:[#allocation25 + $0x78] sm:$0xff] }
 0x7e4   :  { %2462 = vmax.xlane.f32.xlu1 %v2461_v39 }
 0x7e7   :  { %v5580_v47 = vpop.f32.mrb[10].mxu0 }
 0x7e8   :  { %v5582_v48 = vpop.f32.mrb[11].mxu0 }
 0x7e9   :  { %v4126_v43 = vpop.f32.mrb[22].mxu1 }
 0x7ea   :  { %v2875_v51 = vmul.f32 %v4126_v43, %v5322_v11  ;;  %v5586_v45 = vmul.f32 %v4126_v43, %v5325_v12  ;;  %v2694_v57 = vpop.f32.mrb[23].mxu1 }
 0x7eb   :  { %v2874_v58 = vmul.f32 %v5322_v11, %v2694_v57  ;;  %v5590_v60 = vmul.f32 %v5325_v12, %v2694_v57 }
 0x7ed   :  { %v4301_v1 = vpack.c.bf16 %v2875_v51, %v2874_v58  ;;  %v4308_v62 = vpack.c.bf16 %v5586_v45, %v5590_v60  ;;  %v5608_v18 = vpop.f32.mrb[24].mxu1 }
 0x7ee   :  { %v4142_v19 = vpop.f32.mrb[25].mxu1  ;;  %vm2873_vm2 = vcmp.gt.f32.partialorder %v5608_v18, 0.0 }
 0x7ef   :  { %v4082_v0 = vpop.f32.mrb[14].mxu0  ;;  %4303 = vmatpush3.bf16.xpose.msk.msra.mxu1 %vm5516_vm13, %v4301_v1 }
 0x7f0   :  { %v2381_v3 = vmul.f32 %v4082_v0, %v5322_v11  ;;  %v2476_v5 = vmul.f32 %v4082_v0, %v5325_v12  ;;  %v2182_v8 = vpop.f32.mrb[15].mxu0  ;;  %4314 = vmatprep.subr.bf16.mxu1 %v4841_v2 }
 0x7f1   :  { %v2380_v10 = vmul.f32 %v5322_v11, %v2182_v8  ;;  %v2475_v59 = vmul.f32 %v5325_v12, %v2182_v8 }
 0x7f3   :  { %v4279_v13 = vpack.c.bf16 %v2476_v5, %v2475_v59  ;;  %v4282_v14 = vpack.c.bf16 %v2381_v3, %v2380_v10 }
 0x7f5   :  { %4280 = vmatpush3.bf16.msra.mxu0 %v4279_v13 }
 0x7f6   :  { %4148 = vmatmul.mubr.msk.f32.vlgmr.msra.gmra.mrb[26].mxu1 %vm356_vm3, %v5539_v38  ;;  %4281 = vmatprep.subr.bf16.mxu0 %v4841_v2 }
 0x7f7   :  { %4179 = vmatprep.mubr.msk.f32.mxu1 %vm4842_vm0, %v4843_v4 }
 0x7fc   :  { %v2360_v15 = vpop.f32.mrb[16].mxu0 }
 0x7fd   :  { %v2364_v61 = vsel %vm2281_vm15, %v2360_v15, -1e+30  ;;  %v4094_v16 = vpop.f32.mrb[17].mxu0 }
 0x7fe   :  { %v2366_v17 = vsel %vm2365_vm1, %v2364_v61, -inf }
 0x7ff   :  { %2367 = vmax.xlane.f32.xlu0 %v2366_v17 }
 0x871   :  { %v2463_v22 = vpop.xlane.xlu1 %2462 }
 0x872   :  { %v2464_v26 = vsub.f32 %v2460_v52, %v2463_v22  ;;  %v2706_v52 = vld [vmem:[#allocation25 + $0x70] sm:$0xff] }
 0x873   :  { %v4296_v51 = vpack.c.bf16 %v2707_v55, %v2706_v52  ;;  %v3311_v52 = vmul.f32 0.70710677, %v5580_v47 }
 0x874   :  { %v2465_v28 = vmul.f32 1.442695, %v2464_v26 }
 0x876   :  { %4416 = vpow2.f32 %v2465_v28 }
 0x880   :  { %v4417_v25 = vpop.eup %4416 }
 0x881   :  { %v2467_v23 = vmul.f32 %v4417_v25, %v2277_v7 }
 0x883   :  { %v2468_v34 = vsel %vm2365_vm1, %v2467_v23, 0.0 }
 0x884   :  { %2469 = vadd.xlane.f32.xlu0 %v2468_v34  ;;  %v3424_v34 = vld [vmem:[%s5760_s23 + $0x8] sm:$0xff]  ;;  %s3301_s23 = sld [smem:[#allocation2]] }
 0x88a   :  { %s3304_s7 = ssub.f32 1.0, %s3301_s23 }
 0x88c   :  { %v2368_v29 = vpop.xlane.xlu0 %2367 }
 0x88d   :  { %v2369_v30 = vsub.f32 %v2364_v61, %v2368_v29  ;;  %v3437_v29 = vld [vmem:[%s5761_s24] sm:$0xff] }
 0x88f   :  { %v2370_v31 = vmul.f32 1.442695, %v2369_v30 }
 0x891   :  { %4418 = vpow2.f32 %v2370_v31 }
 0x89b   :  { %v4419_v50 = vpop.eup %4418 }
 0x89c   :  { %v2372_v54 = vmul.f32 %v4419_v50, %v2277_v7  ;;  %v4292_v7 = vpack.c.bf16 %v2705_v9, %v2704_v44  ;;  %v3318_v44 = vld [vmem:[#allocation22] sm:$0xff]  ;;  %v3319_v9 = vld [vmem:[#allocation22 + $0x8] sm:$0xff] }
 0x89e   :  { %v2373_v56 = vsel %vm2365_vm1, %v2372_v54, 0.0 }
 0x89f   :  { %2374 = vadd.xlane.f32.xlu1 %v2373_v56 }
 0x8c9   :  { %v2948_v33 = vpop.f32.mrb[26].mxu1 }
 0x8ca   :  { %v2952_v35 = vsel %vm2873_vm2, %v2948_v33, -1e+30  ;;  %v4149_v36 = vpop.f32.mrb[27].mxu1  ;;  %v3217_v33 = vld [vmem:[#allocation19] sm:$0xff] }
 0x8cb   :  { %v2953_v24 = vsel %vm2365_vm1, %v2952_v35, -inf }
 0x8cc   :  { %2954 = vmax.xlane.f32.xlu0 %v2953_v24  ;;  %v3219_v24 = vld [vmem:[#allocation19 + $0x10] sm:$0xff] }
 0x911   :  { %v2470_v20 = vpop.xlane.xlu0 %2469 }
 0x912   :  { %vm2471_vm4 = vcmp.gt.f32.partialorder %v2470_v20, 0.0 }
 0x913   :  { %v2472_v42 = vsel %vm2471_vm4, %v2470_v20, 1.0  ;;  %v3220_v20 = vld [vmem:[#allocation19 + $0x18] sm:$0xff] }
 0x914   :  { %4420 = vrcp.f32 %v2472_v42  ;;  %v4318_v42 = vpack.c.bf16 %v3220_v20, %v3219_v24 }
 0x91e   :  { %v4421_v46 = vpop.eup %4420 }
 0x91f   :  { %v2474_v63 = vmul.f32 %v4421_v46, %v2467_v23  ;;  %v4320_v46 = vpack.c.bf16 %v3319_v9, %v3318_v44 }
 0x921   :  { %4107 = vmatmul.mubr.msk.f32.vlgmr.msra.gmra.mrb[18].mxu0 %vm2365_vm1, %v2474_v63  ;;  %v3310_v63 = vmul.f32 0.70710677, %v5582_v48 }
 0x922   :  { %4283 = vmatpush3.bf16.msra.mxu0 %v4282_v14  ;;  %4113 = vmatprep.mubr.msk.f32.mxu0 %vm4842_vm0, %v4843_v4 }
 0x923   :  { %4293 = vmatprep.subr.bf16.mxu0 %v4292_v7 }
 0x92c   :  { %v2375_v37 = vpop.xlane.xlu1 %2374 }
 0x92d   :  { %vm2376_vm5 = vcmp.gt.f32.partialorder %v2375_v37, 0.0 }
 0x92e   :  { %v2377_v49 = vsel %vm2376_vm5, %v2375_v37, 1.0 }
 0x92f   :  { %4422 = vrcp.f32 %v2377_v49 }
 0x939   :  { %v4423_v39 = vpop.eup %4422 }
 0x93a   :  { %v2379_v43 = vmul.f32 %v4423_v39, %v2372_v54 }
 0x93c   :  { %4114 = vmatmul.mubr.msk.f32.vlgmr.msra.gmra.mrb[18].mxu0 %vm2365_vm1, %v2379_v43  ;;  %v3320_v43 = vld [vmem:[#allocation22 + $0x10] sm:$0xff] }
 0x93d   :  { %4295 = vmatpush3.bf16.msra.mxu0 %v4292_v7  ;;  %4135 = vmatprep.mubr.msk.f32.mxu0 %vm356_vm3, %v5526_v27 }
 0x93e   :  { %4297 = vmatprep.subr.bf16.mxu0 %v4296_v51 }
 0x941   :  { %4299 = vmatpush3.bf16.msra.mxu0 %v4296_v51  ;;  %v3321_v51 = vld [vmem:[#allocation22 + $0x18] sm:$0xff] }
 0x942   :  { %4304 = vmatprep.subr.bf16.mxu0 %v4841_v2 }
 0x944   :  { %4136 = vmatmul.mubr.msk.f32.vlgmr.msra.gmra.mrb[20].mxu0 %vm356_vm3, %v5559_v6 }
 0x945   :  { %4154 = vmatprep.mubr.msk.f32.mxu0 %vm4842_vm0, %v4843_v4 }
 0x959   :  { %v2955_v57 = vpop.xlane.xlu0 %2954 }
 0x95a   :  { %v2956_v58 = vsub.f32 %v2952_v35, %v2955_v57  ;;  %v3218_v35 = vld [vmem:[#allocation19 + $0x8] sm:$0xff] }
 0x95b   :  { %v4315_v36 = vpack.c.bf16 %v3218_v35, %v3217_v33 }
 0x95c   :  { %v2957_v1 = vmul.f32 1.442695, %v2956_v58 }
 0x95d   :  { %4316 = vmatpush3.bf16.msra.mxu1 %v4315_v36 }
 0x95e   :  { %4424 = vpow2.f32 %v2957_v1  ;;  %4317 = vmatprep.subr.bf16.mxu1 %v4841_v2  ;;  %v3308_v1 = vmul.f32 0.5, %v5582_v48 }
 0x961   :  { %4319 = vmatpush3.bf16.msra.mxu1 %v4318_v42 }
 0x962   :  { %4321 = vmatprep.subr.bf16.mxu1 %v4320_v46 }
 0x968   :  { %v4425_v0 = vpop.eup %4424 }
 0x969   :  { %v2959_v3 = vmul.f32 %v4425_v0, %v5608_v18 }
 0x96b   :  { %v2960_v5 = vsel %vm2365_vm1, %v2959_v3, 0.0 }
 0x96c   :  { %2961 = vadd.xlane.f32.xlu1 %v2960_v5 }
 0x9f9   :  { %v2962_v27 = vpop.xlane.xlu1 %2961 }
 0x9fa   :  { %vm2963_vm7 = vcmp.gt.f32.partialorder %v2962_v27, 0.0 }
 0x9fb   :  { %v2964_v8 = vsel %vm2963_vm7, %v2962_v27, 1.0 }
 0x9fc   :  { %4426 = vrcp.f32 %v2964_v8 }
 0xa06   :  { %v4427_v61 = vpop.eup %4426 }
 0xa07   :  { %v2966_v19 = vmul.f32 %v4427_v61, %v2959_v3  ;;  %v4324_v3 = vpack.c.bf16 %v3321_v51, %v3320_v43 }
 0xa17   :  { %v4137_v10 = vpop.f32.mrb[20].mxu0 }
 0xa18   :  { %v2968_v6 = vmul.f32 %v4137_v10, %v5322_v11  ;;  %v3137_v59 = vmul.f32 %v4137_v10, %v5325_v12  ;;  %v2774_v13 = vpop.f32.mrb[21].mxu0  ;;  %v3309_v10 = vmul.f32 0.5, %v5580_v47 }
 0xa19   :  { %v2967_v14 = vmul.f32 %v5322_v11, %v2774_v13  ;;  %v3136_v15 = vmul.f32 %v5325_v12, %v2774_v13 }
 0xa1b   :  { %v4305_v16 = vpack.c.bf16 %v2968_v6, %v2967_v14  ;;  %v4312_v17 = vpack.c.bf16 %v3137_v59, %v3136_v15  ;;  %v3767_v59 = vld [vmem:[#allocation21] ss:$0 sm:$0xff]  ;;  %v3302_v14 = vstv %s3301_s23  ;;  %v3305_v15 = vstv %s3304_s7 }
 0xa1c   :  { %v3306_v47 = vmul.f32 %v3305_v15, %v5251_v32 }
 0xa1d   :  { %4306 = vmatpush3.bf16.msra.mxu0 %v4305_v16 }
 0xa1e   :  { %4307 = vmatprep.subr.bf16.mxu0 %v4841_v2 }
 0xa20   :  { %4155 = vmatmul.mubr.msk.f32.vlgmr.msra.gmra.mrb[18].mxu0 %vm2365_vm1, %v2966_v19 }
 0xa21   :  { %4161 = vmatprep.mubr.msk.f32.mxu0 %vm4842_vm0, %v4843_v4 }
 0xa26   :  { %4310 = vmatpush3.bf16.xpose.msk.msra.mxu0 %vm5516_vm13, %v4308_v62 }
 0xa27   :  { %4311 = vmatprep.subr.bf16.mxu0 %v4841_v2 }
 0xa2d   :  { %4162 = vmatmul.mubr.msk.f32.vlgmr.msra.gmra.mrb[22].mxu0 %vm356_vm3, %v5539_v38  ;;  %v3438_v38 = vld [vmem:[%s5761_s24 + $0x8] sm:$0xff]  ;;  %s5676_s24 = sld [smem:[#allocation2 + $0x1]] }
 0xa2e   :  { %4313 = vmatpush3.bf16.msra.mxu0 %v4312_v17  ;;  %4168 = vmatprep.mubr.msk.f32.mxu0 %vm4842_vm0, %v4843_v4 }
 0xa33   :  { %s3414_s25 = ssub.f32 1.0, %s5676_s24 }
 0xb00   :  { %v3117_v11 = vpop.f32.mrb[22].mxu0 }
 0xb01   :  { %v3121_v12 = vsel %vm2873_vm2, %v3117_v11, -1e+30  ;;  %v4163_v22 = vpop.f32.mrb[23].mxu0 }
 0xb02   :  { %v3122_v26 = vsel %vm2365_vm1, %v3121_v12, -inf }
 0xb03   :  { %3123 = vmax.xlane.f32.xlu0 %v3122_v26 }
 0xb19   :  { %3426 = vperm.xlu0 %4373, %v3423_v21   ;;  %v3411_v21 = vstv %s5676_s24 }
 0xb1d   :  { %3443 = vperm.xlu0 %4373, %v3438_v38   ;;  %v3415_v38 = vstv %s3414_s25 }
 0xb90   :  { %v3124_v45 = vpop.xlane.xlu0 %3123 }
 0xb91   :  { %v3125_v60 = vsub.f32 %v3121_v12, %v3124_v45  ;;  %v3769_v12 = vld [vmem:[#allocation24] ss:$0 sm:$0xff] }
 0xb93   :  { %v3126_v62 = vmul.f32 1.442695, %v3125_v60 }
 0xb95   :  { %4428 = vpow2.f32 %v3126_v62 }
 0xb98   :  { %v3427_v50 = vpop.permute.xlu0 %3426 }
 0xb99   :  { %vm3431_vm8 = vcmp.eq.s32.totalorder %v3427_v50, %v5275_v53 }
 0xb9a   :  { %v3773_v56 = vsel %vm3431_vm8, 1.0, %v4843_v4 }
 0xb9f   :  { %v4429_v28 = vpop.eup %4428 }
 0xba0   :  { %v3128_v25 = vmul.f32 %v4429_v28, %v5608_v18 }
 0xba2   :  { %v3129_v23 = vsel %vm2365_vm1, %v3128_v25, 0.0 }
 0xba3   :  { %3130 = vadd.xlane.f32.xlu1 %v3129_v23 }
 0xbb4   :  { %3429 = vperm.xlu1 %4379, %v3424_v34   ;;  %v3416_v34 = vmul.f32 %v3415_v38, %v5258_v40 }
 0xbb8   :  { %3440 = vperm.xlu1 %4379, %v3437_v29  }
 0xc30   :  { %v3131_v30 = vpop.xlane.xlu1 %3130 }
 0xc31   :  { %vm3132_vm0 = vcmp.gt.f32.partialorder %v3131_v30, 0.0 }
 0xc32   :  { %v3133_v31 = vsel %vm3132_vm0, %v3131_v30, 1.0 }
 0xc33   :  { %4430 = vrcp.f32 %v3133_v31  ;;  %v3444_v31 = vpop.permute.xlu0 %3443 }
 0xc34   :  { %4432 = verf.f32 %v3310_v63  ;;  %v3430_v48 = vpop.permute.xlu1 %3429  ;;  %vm3446_vm11 = vcmp.eq.s32.totalorder %v3444_v31, %v5275_v53 }
 0xc35   :  { %vm3432_vm9 = vcmp.eq.s32.totalorder %v3430_v48, %v5275_v53 }
 0xc36   :  { %v3774_v22 = vsel %vm3432_vm9, 1.0, %v4843_v4 }
 0xc38   :  { %v3441_v17 = vpop.permute.xlu1 %3440 }
 0xc39   :  { %vm3445_vm10 = vcmp.eq.s32.totalorder %v3441_v17, %v5275_v53 }
 0xc3a   :  { %v3775_v45 = vsel %vm3445_vm10, 1.0, %v4843_v4 }
 0xc3d   :  { %v4431_v54 = vpop.eup %4430 }
 0xc3e   :  { %v3135_v18 = vmul.f32 %v4431_v54, %v3128_v25  ;;  %v4433_v55 = vpop.eup %4432  ;;  %v3417_v25 = vmul.f32 %v3415_v38, %v5260_v41  ;;  %v3776_v54 = vsel %vm3446_vm11, 1.0, %v4843_v4 }
 0xc3f   :  { %v3314_v39 = vadd.f32 1.0, %v4433_v55 }
 0xc40   :  { %4169 = vmatmul.mubr.msk.f32.vlgmr.msra.gmra.mrb[18].mxu0 %vm2365_vm1, %v3135_v18 }
 0xc41   :  { %4195 = vmatprep.mubr.msk.f32.mxu0 %vm902_vm6, %v3773_v56  ;;  %v3316_v27 = vmul.f32 %v3314_v39, %v3308_v1 }
 0xd13   :  { %v3207_v7 = vpop.f32.mrb[18].mxu0 }
 0xd14   :  { %v3213_v37 = vmul.f32 0.70710677, %v3207_v7  ;;  %v4170_v49 = vpop.f32.mrb[19].mxu0  ;;  %v3212_v57 = vmul.f32 0.5, %v3207_v7 }
 0xd16   :  { %4434 = verf.f32 %v3213_v37 }
 0xd17   :  { %4436 = verf.f32 %v3311_v52 }
 0xd20   :  { %v4435_v2 = vpop.eup %4434 }
 0xd21   :  { %v3215_v58 = vadd.f32 1.0, %v4435_v2  ;;  %v4437_v5 = vpop.eup %4436 }
 0xd22   :  { %v3315_v8 = vadd.f32 1.0, %v4437_v5 }
 0xd23   :  { %v3216_v0 = vmul.f32 %v3215_v58, %v3212_v57 }
 0xd24   :  { %v3317_v6 = vmul.f32 %v3315_v8, %v3309_v10 }
 0xd25   :  { %4180 = vmatmul.mubr.msk.f32.vlgmr.msra.gmra.mrb[28].mxu1 %vm356_vm3, %v3216_v0 }
 0xd26   :  { %4323 = vmatpush3.bf16.msra.mxu1 %v4320_v46  ;;  %4190 = vmatprep.mubr.msk.f32.mxu1 %vm356_vm3, %v3316_v27 }
 0xd27   :  { %4325 = vmatprep.subr.bf16.mxu1 %v4324_v3 }
 0xd2a   :  { %4327 = vmatpush3.bf16.msra.mxu1 %v4324_v3 }
 0xd2d   :  { %4191 = vmatmul.mubr.msk.f32.vlgmr.msra.gmra.mrb[30].mxu1 %vm356_vm3, %v3317_v6 }
 0xdf8   :  { %v3297_v13 = vpop.f32.mrb[28].mxu1 }
 0xdf9   :  { %v3298_v61 = vadd.f32 %v3767_v59, %v3297_v13  ;;  %v4181_v16 = vpop.f32.mrb[29].mxu1 }
 0xdfb   :  { %v3303_v19 = vmul.f32 %v3302_v14, %v3298_v61 }
 0xdfd   :  { %v3307_v11 = vadd.f32 %v3306_v47, %v3303_v19 }
 0xdff   :  { %4193 = vmatprep.subr.mxu0 %v3307_v11  ;;  %3420 = vst.msk [vmem:[#allocation27] sm:$0xff] %vm356_vm3, %v3307_v11 }
 0xe00   :  { %v4192_v26 = vpop.f32.mrb[30].mxu1  ;;  %4194 = vmatpush3.msra.mxu0 %v3307_v11 }
 0xe01   :  { %v3407_v60 = vadd.f32 %v4192_v26, %v3769_v12  ;;  %v3401_v32 = vpop.f32.mrb[31].mxu1  ;;  %4196 = vmatmul.mubr.msk.f32.vlgmr.msra.gmra.mrb[24].mxu0 %vm902_vm6, %v3774_v22 }
 0xe02   :  { %v3402_v62 = vadd.f32 %v3769_v12, %v3401_v32  ;;  %4202 = vmatprep.mubr.msk.f32.mxu0 %vm2365_vm1, %v3775_v45 }
 0xe03   :  { %v3413_v28 = vmul.f32 %v3411_v21, %v3407_v60 }
 0xe04   :  { %v3412_v23 = vmul.f32 %v3411_v21, %v3402_v62 }
 0xe05   :  { %v3419_v29 = vadd.f32 %v3417_v25, %v3413_v28 }
 0xe06   :  { %v3418_v30 = vadd.f32 %v3416_v34, %v3412_v23 }
 0xe07   :  { %3422 = vst.msk [vmem:[#allocation28 + $0x8] sm:$0xff] %vm356_vm3, %v3419_v29 }
 0xe08   :  { %3421 = vst.msk [vmem:[#allocation28] sm:$0xff] %vm356_vm3, %v3418_v30  ;;  %v4328_v50 = vpack.c.bf16 %v3419_v29, %v3418_v30 }
 0xe0a   :  { %4329 = vmatprep.subr.bf16.mxu0 %v4328_v50 }
 0xe0b   :  { %4331 = vmatpush3.bf16.msra.mxu0 %v4328_v50 }
 0xe0e   :  { %4203 = vmatmul.mubr.msk.f32.vlgmr.msra.gmra.mrb[26].mxu0 %vm2365_vm1, %v3776_v54 }
 0xed4   :  { %v4197_v41 = vpop.f32.mrb[24].mxu0 }
 0xed5   :  { %v3523_v18 = vpop.f32.mrb[25].mxu0 }
 0xee1   :  { %v4204_v56 = vpop.f32.mrb[26].mxu0 }
 0xee2   :  { %v3614_v40 = vmul.f32 %v4204_v56, %v4197_v41  ;;  %v3604_v33 = vpop.f32.mrb[27].mxu0 }
 0xee3   :  { %v3613_v35 = vmul.f32 %v3604_v33, %v3523_v18 }
 0xee4   :  { %v3618_v36 = vsel %vm356_vm3, %v3614_v40, 0.0 }
 0xee5   :  { %3619 = vadd.xlane.f32.xlu0 %v3618_v36  ;;  %v3615_v24 = vsel %vm356_vm3, %v3613_v35, 0.0 }
 0xee6   :  { %3616 = vadd.xlane.f32.xlu1 %v3615_v24 }
 0xee7   :  { %4769 = shalt.err (!%p4766_p9)
}
 0xee8   :  { %s5807_s22 = sld [smem:[#allocation53_spill]] }
 0xeee   :  { %s4770_s8 = scalar_lea.hbm %s5807_s22, 128 }
 0xeef   :  { %p4771_p10 = scmp.ne.s32.totalorder %s5807_s22, %s4770_s8  ;;  %p4774_p11 = scmp.lt.u32.totalorder %s4770_s8, %s5807_s22 }
 0xef1   :  { %p4776_p12 = pnand %p4774_p11, %p4771_p10 }
 0xef3   :  { %4779 = shalt.err (!%p4776_p12)
}
 0xef4   :  { %3633 = dma.vmem_to_hbm [thread:$0]  %s3631_s10, 128, %s5807_s22, [#allocation4]  }
 0xef5   :  { %s4780_s29 = scalar_lea.vmem %s5697_s26, 256  ;;  %p4785_p0 = scmp.lt.s32.totalorder %s5697_s26, %s5697_s26 }
 0xef6   :  { %p4781_p13 = scmp.ne.s32.totalorder %s5697_s26, %s4780_s29  ;;  %p4786_p1 = scmp.lt.s32.totalorder %s4780_s29, %s4780_s29 }
 0xef8   :  { %p4787_p2 = por %p4786_p1, %p4785_p0 }
 0xefa   :  { %p4788_p3 = pnand %p4787_p2, %p4781_p13 }
 0xefc   :  { %4791 = shalt.err (!%p4788_p3)
}
 0xefd   :  { %s5808_s16 = sld [smem:[#allocation54_spill]] }
 0xf03   :  { %s4792_s12 = scalar_lea.hbm %s5808_s16, 256 }
 0xf04   :  { %p4793_p4 = scmp.ne.s32.totalorder %s5808_s16, %s4792_s12  ;;  %p4796_p5 = scmp.lt.u32.totalorder %s4792_s12, %s5808_s16 }
 0xf06   :  { %p4798_p6 = pnand %p4796_p5, %p4793_p4 }
 0xf08   :  { %4801 = shalt.err (!%p4798_p6)
}
 0xf09   :  { %3645 = dma.vmem_to_hbm [thread:$0]  %s5697_s26, 256, %s5808_s16, [#allocation29], %s4825_s6, %s4825_s6, %s4826_s11   ;;  %vm3621_vm3 = vcmask 7168  }
 0xf0a   :  { %s5809_s25 = sld [smem:[#allocation55_spill]] }
 0xf72   :  { %v3620_v4 = vpop.xlane.xlu0 %3619 }
 0xf73   :  { %3623 = vst.msk [vmem:[%s5809_s25 + $0x8] sm:$0xff] %vm3621_vm3, %v3620_v4  ;;  %v3617_v53 = vpop.xlane.xlu1 %3616 }
 0xf74   :  { %3622 = vst.msk [vmem:[%s5809_s25] sm:$0xff] %vm3621_vm3, %v3617_v53 }
 0xf75   :  { %4820 = dma.done.wait [#allocation4], 128  }
 0xf76   :  { %4821 = vsyncadd [#allocation4], 4294967168 }
 0xf77   :  { %4822 = dma.done.wait [#allocation29], 256  }
 0xf78   :  { %4823 = vsyncadd [#allocation29], 4294967040 }
 0xf79   :  { %3656 = vsyncpa [#allocation3], 1 }
 0xf7a   :  { %3657 = vsyncpa [#allocation8], 1 }
 0xf7b   :  { %3658 = vsyncpa [#allocation11], 1 }
 0xf7c   :  { %3659 = vsyncpa [#allocation14], 1 }
 0xf7d   :  { %3660 = vsyncpa [#allocation17], 1 }
 0xf7e   :  { %3661 = vsyncpa [#allocation20], 1 }
 0xf7f   :  { %3662 = vsyncpa [#allocation23], 1 }
 0xf80   :  { %3663 = vsyncpa [#allocation26], 1 }
 0xf81   :  { %3664 = vsyncpa [#allocation4], 1 }
 0xf82   :  { %3665 = vsyncpa [#allocation29], 1 }
 0xf83   :  { %3666 = vsyncpa [#allocation5], 1 }

</bundles_post_ra>
